<compile_context>
chip_gen: v7x
topology: tpu7x:2x2x1
jax: 0.10.0
libtpu: 0.0.40
codegen_flags: <defaults>
</compile_context>

<pallas_src>
import jax
import jax.numpy as jnp
from jax import lax
from jax.experimental import pallas as pl
from jax.experimental.pallas import tpu as pltpu

# --- small PaLM hyperparameters (scaled-down, consistent with the module defaults) ---
NUM_TOKENS = 256
DIM = 32
DEPTH = 2
HEADS = 4
DIM_HEAD = 16
FF_MULT = 4
LORA_R = 8
LORA_SCALE = 1.0            # LoRA alpha defaults to r -> alpha / r = 1
XPOS_SCALE_BASE = 512
LN_EPS = 1e-5
NEG_BIAS = -1e30            # finite masked-score sentinel (exp underflows to exactly 0)

ATTN_INNER = HEADS * DIM_HEAD          # 64
FF_INNER = DIM * FF_MULT               # 128
FUSED = ATTN_INNER + DIM_HEAD + DIM_HEAD + 2 * FF_INNER   # original fused proj width (352)

MXU_DTYPE = jnp.bfloat16               # matmul operand dtype; accumulation stays f32

# Column layout of the re-fused per-layer projection weight (512 cols, groups vreg-friendly):
Q_OFF = 0                              # q                     (64)
QSW_OFF = 64                           # q, rotate_half folded (64)
FF_X_OFF = 128                         # SwiGLU 'x'            (128)  128-aligned
FF_G_OFF = 256                         # SwiGLU gate           (128)  128-aligned
K_OFF = 384                            # k                     (16)   128-aligned
KSW_OFF = 400                          # k, rotate_half folded (16)
V_OFF = 416                            # v                     (16)
FUSED_COLS = 512

# Packed rope-table slab offsets (per-row tables, q tables tiled per head):
QC_OFF = 0                             # cos * scale * dh^-0.5     (64)
QS_OFF = 64                            # sin * scale * sign * dh^-0.5 (64)
KC_OFF = 128                           # cos / scale               (16)
KS_OFF = 144                           # sin / scale * sign        (16)
ROPE_COLS = 160


# ----------------------------- in-kernel helpers -----------------------------

def _layer_norm(x, gamma):
    # F.layer_norm over last dim, beta == 0 (registered buffer), eps=1e-5  — all f32
    mean = jnp.mean(x, axis=-1, keepdims=True)
    var = jnp.mean(jnp.square(x - mean), axis=-1, keepdims=True)
    return (x - mean) * lax.rsqrt(var + LN_EPS) * gamma


def _mm(a, b):
    # MXU matmul: bf16 operands, f32 accumulation.
    return jnp.dot(a.astype(MXU_DTYPE), b.astype(MXU_DTYPE),
                   preferred_element_type=jnp.float32)


# --------------------------- single fused PaLM forward kernel ---------------------------

def palm_kernel(x_ref, gam_ref, wf_ref, wffo_ref, wao_ref, wlog_ref, rope_ref, bias_ref,
                o_ref):
    x = x_ref[0]                                      # (R, D) f32 residual stream
    R = x.shape[0]
    qc = rope_ref[:, QC_OFF:QC_OFF + ATTN_INNER]      # (R, H*Dh)
    qs = rope_ref[:, QS_OFF:QS_OFF + ATTN_INNER]      # (R, H*Dh)
    kc = rope_ref[:, KC_OFF:KC_OFF + DIM_HEAD]        # (R, Dh)
    ks = rope_ref[:, KS_OFF:KS_OFF + DIM_HEAD]        # (R, Dh)
    bias = bias_ref[...]                              # (H*R, R) additive causal(+batch-block)

    # TODO(synk): at much larger DEPTH/HEADS convert these static unrolls to lax.fori_loop
    # over stacked weights to bound vreg live ranges.
    for l in range(DEPTH):
        xn = _layer_norm(x, gam_ref[l])               # (R, D)

        # ONE fused projection per layer: q | q_swapped | ff_x | ff_gate | k | k_swapped | v
        fused = _mm(xn, wf_ref[l])                    # (R, 512) f32

        # parallel SwiGLU feed-forward branch (both slices 128-lane aligned)
        ff_act = (jax.nn.silu(fused[:, FF_G_OFF:FF_G_OFF + FF_INNER])
                  * fused[:, FF_X_OFF:FF_X_OFF + FF_INNER])
        acc = x + _mm(ff_act, wffo_ref[l])            # residual + ff branch

        # xpos rotary: rotate_half pre-folded into the *_swapped weight columns,
        # dim_head**-0.5 pre-folded into the q tables -> 2 FMAs, no lane shuffles.
        q_rot = (fused[:, Q_OFF:Q_OFF + ATTN_INNER] * qc
                 + fused[:, QSW_OFF:QSW_OFF + ATTN_INNER] * qs)     # (R, H*Dh)
        k_rot = (fused[:, K_OFF:K_OFF + DIM_HEAD] * kc
                 + fused[:, KSW_OFF:KSW_OFF + DIM_HEAD] * ks)       # (R, Dh)
        v = fused[:, V_OFF:V_OFF + DIM_HEAD]                        # (R, Dh)

        # stack heads into sublanes -> ONE sim matmul / softmax / pv matmul for all heads
        q_st = jnp.concatenate(
            [q_rot[:, h * DIM_HEAD:(h + 1) * DIM_HEAD] for h in range(HEADS)], axis=0)
        sim = _mm(q_st, k_rot.T) + bias                             # (H*R, R)
        sim = sim - jnp.max(sim, axis=-1, keepdims=True)
        p = jnp.exp(sim)
        p = p * pl.reciprocal(jnp.sum(p, axis=-1, keepdims=True), approx=True)
        pv = _mm(p, v)                                              # (H*R, Dh)

        # unstack heads back into lanes, single fused output projection for all heads
        pv_w = jnp.concatenate([pv[h * R:(h + 1) * R, :] for h in range(HEADS)], axis=-1)
        x = acc + _mm(pv_w, wao_ref[l])                             # (R, D)

    # final LayerNorm + to_logits (weight tied to the token embedding); V=256 -> lane-dense out
    xn = _layer_norm(x, gam_ref[DEPTH])
    o_ref[0] = _mm(xn, wlog_ref[...])


# --------------------------------- wrappers ---------------------------------

def _full_spec(arr):
    zeros = (0,) * arr.ndim
    return pl.BlockSpec(arr.shape, lambda *_: zeros)


def _half_swap_cols(w, dh=DIM_HEAD):
    # permute output columns so (x @ w_swapped) == rotate-half (no sign) of (x @ w), per head
    d_in, d_out = w.shape
    w3 = w.reshape(d_in, d_out // dh, dh)
    return jnp.concatenate([w3[..., dh // 2:], w3[..., :dh // 2]], axis=-1).reshape(d_in, d_out)


def prepare_weights(params):
    """Fold LoRA into base weights, fold rotate_half into extra weight columns,
    re-fuse everything into one padded, 128-lane-aligned projection per layer."""
    w_fused_l, wffo_l, wao_l, gam_l = [], [], [], []
    for p in params['layers']:
        wf = p['w_fused']
        q = wf[:, :ATTN_INNER] + (p['lq_A'] @ p['lq_B']) * LORA_SCALE
        k = wf[:, ATTN_INNER:ATTN_INNER + DIM_HEAD] + (p['lk_A'] @ p['lk_B']) * LORA_SCALE
        v = (wf[:, ATTN_INNER + DIM_HEAD:ATTN_INNER + 2 * DIM_HEAD]
             + (p['lv_A'] @ p['lv_B']) * LORA_SCALE)
        ff = wf[:, ATTN_INNER + 2 * DIM_HEAD:]                       # (D, 2*FF_INNER)
        ao = p['w_attn_out'] + (p['lo_A'] @ p['lo_B']) * LORA_SCALE  # (H*Dh, D)

        big = jnp.zeros((DIM, FUSED_COLS), jnp.float32)
        big = big.at[:, Q_OFF:Q_OFF + ATTN_INNER].set(q)
        big = big.at[:, QSW_OFF:QSW_OFF + ATTN_INNER].set(_half_swap_cols(q))
        big = big.at[:, FF_X_OFF:FF_X_OFF + FF_INNER].set(ff[:, :FF_INNER])
        big = big.at[:, FF_G_OFF:FF_G_OFF + FF_INNER].set(ff[:, FF_INNER:])
        big = big.at[:, K_OFF:K_OFF + DIM_HEAD].set(k)
        big = big.at[:, KSW_OFF:KSW_OFF + DIM_HEAD].set(_half_swap_cols(k))
        big = big.at[:, V_OFF:V_OFF + DIM_HEAD].set(v)

        w_fused_l.append(big)
        wffo_l.append(p['w_ff_out'])
        wao_l.append(ao)
        gam_l.append(p['gamma'])

    gammas = jnp.stack(gam_l + [params['norm_gamma']])               # (DEPTH+1, 1, D) f32
    return dict(
        gammas=gammas,
        w_fused=jnp.stack(w_fused_l).astype(MXU_DTYPE),              # (DEPTH, D, 512)
        w_ff_out=jnp.stack(wffo_l).astype(MXU_DTYPE),                # (DEPTH, FF_INNER, D)
        w_attn_out=jnp.stack(wao_l).astype(MXU_DTYPE),               # (DEPTH, H*Dh, D)
        w_logits=params['token_emb'].T.astype(MXU_DTYPE),            # (D, V) tied embedding
    )


def precompute_tables(n, reps):
    """Packed xpos rotary slab (q tables carry the dh^-0.5 scale and the rotate-half sign),
    tiled `reps` times along rows for batch folding; q tables tiled per head along lanes."""
    half = DIM_HEAD // 2
    inv_freq = 1.0 / (10000.0 ** (jnp.arange(0, DIM_HEAD, 2, dtype=jnp.float32) / DIM_HEAD))
    t = jnp.arange(n, dtype=jnp.float32)
    freqs = jnp.einsum('i,j->ij', t, inv_freq)
    freqs = jnp.concatenate([freqs, freqs], axis=-1)                  # (n, Dh)
    cos, sin = jnp.cos(freqs), jnp.sin(freqs)
    scale_vec = (jnp.arange(0, DIM_HEAD, 2, dtype=jnp.float32) + 0.4 * DIM_HEAD) / (1.4 * DIM_HEAD)
    power = (t - (n // 2)) / XPOS_SCALE_BASE
    scale = scale_vec[None, :] ** power[:, None]
    scale = jnp.concatenate([scale, scale], axis=-1)                  # (n, Dh)
    sign = jnp.concatenate([-jnp.ones((half,), jnp.float32),
                            jnp.ones((half,), jnp.float32)])
    inv_sqrt_d = DIM_HEAD ** -0.5
    q_cos = cos * scale * inv_sqrt_d
    q_sin = sin * scale * sign * inv_sqrt_d
    k_cos = cos / scale
    k_sin = sin / scale * sign
    rep = lambda a: jnp.tile(a, (reps, 1))                            # fold batch into rows
    q_cos, q_sin, k_cos, k_sin = map(rep, (q_cos, q_sin, k_cos, k_sin))
    rope = jnp.concatenate([jnp.tile(q_cos, (1, HEADS)), jnp.tile(q_sin, (1, HEADS)),
                            k_cos, k_sin], axis=-1)                   # (reps*n, 160)
    return rope


def build_bias(n, reps):
    """Additive causal bias, block-diagonal over the folded batch, tiled over stacked heads."""
    # TODO(synk): at large N build this mask in-kernel from broadcasted_iota to avoid the
    # O(H*N^2) HBM/VMEM table (matters on v7x's 64 MiB VMEM); trivial at this toy size.
    r = n * reps
    rows = jnp.arange(r)
    cols = jnp.arange(r)
    same_seq = (rows[:, None] // n) == (cols[None, :] // n)
    causal = (cols[None, :] % n) <= (rows[:, None] % n)
    bias = jnp.where(same_seq & causal, 0.0, NEG_BIAS).astype(jnp.float32)   # (r, r)
    return jnp.tile(bias, (HEADS, 1))                                        # (H*r, r)


def _prefer_parallel_batch(batch):
    # v7x has 2 TensorCores/chip -> keep a parallel grid over batch; v5e/v6e are single-TC,
    # so fold batch into sublanes instead (removes the serial second grid iteration).
    if batch < 2:
        return False
    try:
        kind = jax.devices()[0].device_kind.lower()
    except Exception:
        return False
    return 'v7' in kind


def palm_forward(x, w, parallel_batch):
    B, N, D = x.shape
    V = w['w_logits'].shape[-1]
    if parallel_batch:
        grid_n, rows, reps = B, N, 1
        x_in = x
    else:
        grid_n, rows, reps = 1, B * N, B
        x_in = x.reshape(1, B * N, D)

    rope = precompute_tables(N, reps)          # (rows, 160)
    bias = build_bias(N, reps)                 # (HEADS*rows, rows)

    inputs = (x_in, w['gammas'], w['w_fused'], w['w_ff_out'], w['w_attn_out'],
              w['w_logits'], rope, bias)
    in_specs = [pl.BlockSpec((1, rows, D), lambda g: (g, 0, 0))]
    in_specs += [_full_spec(a) for a in inputs[1:]]
    out_spec = pl.BlockSpec((1, rows, V), lambda g: (g, 0, 0))   # 256-lane-dense output

    out = pl.pallas_call(
        palm_kernel,
        out_shape=jax.ShapeDtypeStruct((grid_n, rows, V), jnp.float32),
        grid_spec=pltpu.PrefetchScalarGridSpec(
            num_scalar_prefetch=0, grid=(grid_n,),
            in_specs=in_specs, out_specs=out_spec),
        compiler_params=pltpu.CompilerParams(dimension_semantics=("parallel",)),
    )(*inputs)
    return out.reshape(B, N, V)


def actor_forward(tokens, params):
    # token embedding lookup (gather) — plain-JAX glue
    x = params['token_emb'][tokens].astype(jnp.float32)        # (B, N, D)
    w = prepare_weights(params)                                # LoRA/rotate-half folding
    return palm_forward(x, w, _prefer_parallel_batch(tokens.shape[0]))


# ----------------------------- deterministic init -----------------------------

def init_params(key):
    ks = iter(jax.random.split(key, 8 * DEPTH + 4))
    def nrm(k, shape, std):
        return jax.random.normal(k, shape, dtype=jnp.float32) * std

    token_emb = nrm(next(ks), (NUM_TOKENS, DIM), 0.02)          # nn.init.normal_(std=0.02)
    layers = []
    for _ in range(DEPTH):
        layers.append(dict(
            gamma=jnp.ones((1, DIM), jnp.float32),
            w_fused=nrm(next(ks), (DIM, FUSED), DIM ** -0.5),
            w_attn_out=nrm(next(ks), (ATTN_INNER, DIM), ATTN_INNER ** -0.5),
            w_ff_out=nrm(next(ks), (FF_INNER, DIM), FF_INNER ** -0.5),
            # LoRA: A ~ randn, B = zeros (exactly as the module's init)
            lq_A=nrm(next(ks), (DIM, LORA_R), 1.0),
            lq_B=jnp.zeros((LORA_R, ATTN_INNER), jnp.float32),
            lk_A=nrm(next(ks), (DIM, LORA_R), 1.0),
            lk_B=jnp.zeros((LORA_R, DIM_HEAD), jnp.float32),
            lv_A=nrm(next(ks), (DIM, LORA_R), 1.0),
            lv_B=jnp.zeros((LORA_R, DIM_HEAD), jnp.float32),
            lo_A=nrm(next(ks), (ATTN_INNER, LORA_R), 1.0),
            lo_B=jnp.zeros((LORA_R, DIM), jnp.float32),
        ))
    return dict(token_emb=token_emb, layers=layers,
                norm_gamma=jnp.ones((1, DIM), jnp.float32))


if __name__ == "__main__":
    key = jax.random.PRNGKey(0)
    params = init_params(key)

    B, N = 2, 8
    tokens = jax.random.randint(jax.random.fold_in(key, 123), (B, N), 0, NUM_TOKENS)

    # TODO(synk): Actor.generate (sampling loop / eos masking) is host-side control flow;
    # only the forward() logits path is implemented here.
    logits = jax.jit(actor_forward)(tokens, params)
    logits = jax.block_until_ready(logits)

    assert logits.shape == (B, N, NUM_TOKENS), logits.shape
    assert bool(jnp.all(jnp.isfinite(logits)))
    print("KERNEL_OK")
</pallas_src>

<mosaic_0001>
module attributes {stable_mosaic.version = 11 : i64} {
  func.func @palm_kernel(%arg0: i32, %arg1: memref<1x16x32xf32, #tpu.memory_space<vmem>>, %arg2: memref<3x1x32xf32, #tpu.memory_space<vmem>>, %arg3: memref<2x32x512xbf16, #tpu.memory_space<vmem>>, %arg4: memref<2x128x32xbf16, #tpu.memory_space<vmem>>, %arg5: memref<2x64x32xbf16, #tpu.memory_space<vmem>>, %arg6: memref<32x256xbf16, #tpu.memory_space<vmem>>, %arg7: memref<16x160xf32, #tpu.memory_space<vmem>>, %arg8: memref<64x16xf32, #tpu.memory_space<vmem>>, %arg9: memref<1x16x256xf32, #tpu.memory_space<vmem>>) attributes {dimension_semantics = [#tpu.dimension_semantics<parallel>], iteration_bounds = array<i64: 1>, scalar_prefetch = 0 : i64, scratch_operands = 0 : i64, tpu.core_type = #tpu.core_type<tc>, window_params = [{transform_indices = @transform_0, window_bounds = array<i64: 1, 16, 32>}, {pipeline_mode = #tpu.pipeline_mode<synchronous>, transform_indices = @transform_1, window_bounds = array<i64: 3, 1, 32>}, {pipeline_mode = #tpu.pipeline_mode<synchronous>, transform_indices = @transform_2, window_bounds = array<i64: 2, 32, 512>}, {pipeline_mode = #tpu.pipeline_mode<synchronous>, transform_indices = @transform_3, window_bounds = array<i64: 2, 128, 32>}, {pipeline_mode = #tpu.pipeline_mode<synchronous>, transform_indices = @transform_4, window_bounds = array<i64: 2, 64, 32>}, {pipeline_mode = #tpu.pipeline_mode<synchronous>, transform_indices = @transform_5, window_bounds = array<i64: 32, 256>}, {pipeline_mode = #tpu.pipeline_mode<synchronous>, transform_indices = @transform_6, window_bounds = array<i64: 16, 160>}, {pipeline_mode = #tpu.pipeline_mode<synchronous>, transform_indices = @transform_7, window_bounds = array<i64: 64, 16>}, {transform_indices = @transform_8, window_bounds = array<i64: 1, 16, 256>}]} {
    %c0 = arith.constant 0 : index
    %c0_0 = arith.constant 0 : index
    %c0_1 = arith.constant 0 : index
    %0 = vector.load %arg1[%c0, %c0_0, %c0_1] : memref<1x16x32xf32, #tpu.memory_space<vmem>>, vector<1x16x32xf32>
    %1 = vector.shape_cast %0 : vector<1x16x32xf32> to vector<16x32xf32>
    %c0_2 = arith.constant 0 : index
    %c0_3 = arith.constant 0 : index
    %2 = vector.load %arg7[%c0_2, %c0_3] : memref<16x160xf32, #tpu.memory_space<vmem>>, vector<16x64xf32>
    %c0_4 = arith.constant 0 : index
    %c64 = arith.constant 64 : index
    %3 = vector.load %arg7[%c0_4, %c64] : memref<16x160xf32, #tpu.memory_space<vmem>>, vector<16x64xf32>
    %c0_5 = arith.constant 0 : index
    %c128 = arith.constant 128 : index
    %4 = vector.load %arg7[%c0_5, %c128] : memref<16x160xf32, #tpu.memory_space<vmem>>, vector<16x16xf32>
    %c0_6 = arith.constant 0 : index
    %c144 = arith.constant 144 : index
    %5 = vector.load %arg7[%c0_6, %c144] : memref<16x160xf32, #tpu.memory_space<vmem>>, vector<16x16xf32>
    %c0_7 = arith.constant 0 : index
    %c0_8 = arith.constant 0 : index
    %6 = vector.load %arg8[%c0_7, %c0_8] : memref<64x16xf32, #tpu.memory_space<vmem>>, vector<64x16xf32>
    %c0_9 = arith.constant 0 : index
    %c0_10 = arith.constant 0 : index
    %c0_11 = arith.constant 0 : index
    %7 = vector.load %arg2[%c0_9, %c0_10, %c0_11] : memref<3x1x32xf32, #tpu.memory_space<vmem>>, vector<1x1x32xf32>
    %8 = vector.shape_cast %7 : vector<1x1x32xf32> to vector<1x32xf32>
    %cst = arith.constant dense<0.000000e+00> : vector<16xf32>
    %9 = vector.multi_reduction <add>, %1, %cst [1] : vector<16x32xf32> to vector<16xf32>
    %10 = vector.shape_cast %9 : vector<16xf32> to vector<16x1xf32>
    %cst_12 = arith.constant 3.200000e+01 : f32
    %11 = vector.broadcast %cst_12 : f32 to vector<16x1xf32>
    %12 = arith.divf %10, %11 : vector<16x1xf32>
    %13 = vector.broadcast %12 : vector<16x1xf32> to vector<16x32xf32>
    %14 = arith.subf %1, %13 : vector<16x32xf32>
    %15 = arith.mulf %14, %14 : vector<16x32xf32>
    %cst_13 = arith.constant dense<0.000000e+00> : vector<16xf32>
    %16 = vector.multi_reduction <add>, %15, %cst_13 [1] : vector<16x32xf32> to vector<16xf32>
    %17 = vector.shape_cast %16 : vector<16xf32> to vector<16x1xf32>
    %cst_14 = arith.constant 3.200000e+01 : f32
    %18 = vector.broadcast %cst_14 : f32 to vector<16x1xf32>
    %19 = arith.divf %17, %18 : vector<16x1xf32>
    %20 = vector.broadcast %12 : vector<16x1xf32> to vector<16x32xf32>
    %21 = arith.subf %1, %20 : vector<16x32xf32>
    %cst_15 = arith.constant 9.99999974E-6 : f32
    %22 = vector.broadcast %cst_15 : f32 to vector<16x1xf32>
    %23 = arith.addf %19, %22 : vector<16x1xf32>
    %24 = math.rsqrt %23 : vector<16x1xf32>
    %25 = vector.broadcast %24 : vector<16x1xf32> to vector<16x32xf32>
    %26 = arith.mulf %21, %25 : vector<16x32xf32>
    %27 = vector.broadcast %8 : vector<1x32xf32> to vector<16x32xf32>
    %28 = arith.mulf %26, %27 : vector<16x32xf32>
    %c0_16 = arith.constant 0 : index
    %c0_17 = arith.constant 0 : index
    %c0_18 = arith.constant 0 : index
    %29 = vector.load %arg3[%c0_16, %c0_17, %c0_18] : memref<2x32x512xbf16, #tpu.memory_space<vmem>>, vector<1x32x512xbf16>
    %30 = vector.shape_cast %29 : vector<1x32x512xbf16> to vector<32x512xbf16>
    %31 = arith.truncf %28 : vector<16x32xf32> to vector<16x32xbf16>
    %cst_19 = arith.constant dense<0.000000e+00> : vector<16x512xf32>
    %32 = tpu.matmul %31, %30, %cst_19 {dimension_numbers = #tpu.dot_dimension_numbers<[1], [0], [0], [1], [0, 0, 1, 1], [], []>} : vector<16x32xbf16>, vector<32x512xbf16>, vector<16x512xf32> -> vector<16x512xf32>
    %33 = vector.extract_strided_slice %32 {offsets = [0, 256], sizes = [16, 128], strides = [1, 1]} : vector<16x512xf32> to vector<16x128xf32>
    %34 = arith.negf %33 : vector<16x128xf32>
    %35 = math.exp %34 : vector<16x128xf32>
    %cst_20 = arith.constant 1.000000e+00 : f32
    %36 = vector.broadcast %cst_20 : f32 to vector<16x128xf32>
    %37 = arith.addf %36, %35 : vector<16x128xf32>
    %38 = arith.divf %36, %37 : vector<16x128xf32>
    %39 = arith.mulf %33, %38 : vector<16x128xf32>
    %40 = vector.extract_strided_slice %32 {offsets = [0, 128], sizes = [16, 128], strides = [1, 1]} : vector<16x512xf32> to vector<16x128xf32>
    %41 = arith.mulf %39, %40 : vector<16x128xf32>
    %c0_21 = arith.constant 0 : index
    %c0_22 = arith.constant 0 : index
    %c0_23 = arith.constant 0 : index
    %42 = vector.load %arg4[%c0_21, %c0_22, %c0_23] : memref<2x128x32xbf16, #tpu.memory_space<vmem>>, vector<1x128x32xbf16>
    %43 = vector.shape_cast %42 : vector<1x128x32xbf16> to vector<128x32xbf16>
    %44 = arith.truncf %41 : vector<16x128xf32> to vector<16x128xbf16>
    %cst_24 = arith.constant dense<0.000000e+00> : vector<16x32xf32>
    %45 = tpu.matmul %44, %43, %cst_24 {dimension_numbers = #tpu.dot_dimension_numbers<[1], [0], [0], [1], [0, 0, 1, 1], [], []>} : vector<16x128xbf16>, vector<128x32xbf16>, vector<16x32xf32> -> vector<16x32xf32>
    %46 = arith.addf %1, %45 : vector<16x32xf32>
    %47 = vector.extract_strided_slice %32 {offsets = [0, 0], sizes = [16, 64], strides = [1, 1]} : vector<16x512xf32> to vector<16x64xf32>
    %48 = arith.mulf %47, %2 : vector<16x64xf32>
    %49 = vector.extract_strided_slice %32 {offsets = [0, 64], sizes = [16, 64], strides = [1, 1]} : vector<16x512xf32> to vector<16x64xf32>
    %50 = arith.mulf %49, %3 : vector<16x64xf32>
    %51 = arith.addf %48, %50 : vector<16x64xf32>
    %52 = vector.extract_strided_slice %32 {offsets = [0, 384], sizes = [16, 16], strides = [1, 1]} : vector<16x512xf32> to vector<16x16xf32>
    %53 = arith.mulf %52, %4 : vector<16x16xf32>
    %54 = vector.extract_strided_slice %32 {offsets = [0, 400], sizes = [16, 16], strides = [1, 1]} : vector<16x512xf32> to vector<16x16xf32>
    %55 = arith.mulf %54, %5 : vector<16x16xf32>
    %56 = arith.addf %53, %55 : vector<16x16xf32>
    %57 = vector.extract_strided_slice %32 {offsets = [0, 416], sizes = [16, 16], strides = [1, 1]} : vector<16x512xf32> to vector<16x16xf32>
    %58 = vector.extract_strided_slice %51 {offsets = [0, 0], sizes = [16, 16], strides = [1, 1]} : vector<16x64xf32> to vector<16x16xf32>
    %59 = vector.extract_strided_slice %51 {offsets = [0, 16], sizes = [16, 16], strides = [1, 1]} : vector<16x64xf32> to vector<16x16xf32>
    %60 = vector.extract_strided_slice %51 {offsets = [0, 32], sizes = [16, 16], strides = [1, 1]} : vector<16x64xf32> to vector<16x16xf32>
    %61 = vector.extract_strided_slice %51 {offsets = [0, 48], sizes = [16, 16], strides = [1, 1]} : vector<16x64xf32> to vector<16x16xf32>
    %62 = tpu.concatenate %58, %59, %60, %61 in 0 : vector<16x16xf32>, vector<16x16xf32>, vector<16x16xf32>, vector<16x16xf32> -> vector<64x16xf32>
    %63 = tpu.transpose %56, [1, 0] : vector<16x16xf32> -> vector<16x16xf32>
    %64 = arith.truncf %62 : vector<64x16xf32> to vector<64x16xbf16>
    %65 = arith.truncf %63 : vector<16x16xf32> to vector<16x16xbf16>
    %cst_25 = arith.constant dense<0.000000e+00> : vector<64x16xf32>
    %66 = tpu.matmul %64, %65, %cst_25 {dimension_numbers = #tpu.dot_dimension_numbers<[1], [0], [0], [1], [0, 0, 1, 1], [], []>} : vector<64x16xbf16>, vector<16x16xbf16>, vector<64x16xf32> -> vector<64x16xf32>
    %67 = arith.addf %66, %6 : vector<64x16xf32>
    %cst_26 = arith.constant dense<0xFF800000> : vector<64xf32>
    %68 = vector.multi_reduction <maximumf>, %67, %cst_26 [1] : vector<64x16xf32> to vector<64xf32>
    %69 = vector.shape_cast %68 : vector<64xf32> to vector<64x1xf32>
    %70 = vector.broadcast %69 : vector<64x1xf32> to vector<64x16xf32>
    %71 = arith.subf %67, %70 : vector<64x16xf32>
    %72 = math.exp %71 : vector<64x16xf32>
    %cst_27 = arith.constant dense<0.000000e+00> : vector<64xf32>
    %73 = vector.multi_reduction <add>, %72, %cst_27 [1] : vector<64x16xf32> to vector<64xf32>
    %74 = vector.shape_cast %73 : vector<64xf32> to vector<64x1xf32>
    %75 = tpu.reciprocal %74 {approx = true} : vector<64x1xf32> -> vector<64x1xf32>
    %76 = vector.broadcast %75 : vector<64x1xf32> to vector<64x16xf32>
    %77 = arith.mulf %72, %76 : vector<64x16xf32>
    %78 = arith.truncf %77 : vector<64x16xf32> to vector<64x16xbf16>
    %79 = arith.truncf %57 : vector<16x16xf32> to vector<16x16xbf16>
    %cst_28 = arith.constant dense<0.000000e+00> : vector<64x16xf32>
    %80 = tpu.matmul %78, %79, %cst_28 {dimension_numbers = #tpu.dot_dimension_numbers<[1], [0], [0], [1], [0, 0, 1, 1], [], []>} : vector<64x16xbf16>, vector<16x16xbf16>, vector<64x16xf32> -> vector<64x16xf32>
    %81 = vector.extract_strided_slice %80 {offsets = [0, 0], sizes = [16, 16], strides = [1, 1]} : vector<64x16xf32> to vector<16x16xf32>
    %82 = vector.extract_strided_slice %80 {offsets = [16, 0], sizes = [16, 16], strides = [1, 1]} : vector<64x16xf32> to vector<16x16xf32>
    %83 = vector.extract_strided_slice %80 {offsets = [32, 0], sizes = [16, 16], strides = [1, 1]} : vector<64x16xf32> to vector<16x16xf32>
    %84 = vector.extract_strided_slice %80 {offsets = [48, 0], sizes = [16, 16], strides = [1, 1]} : vector<64x16xf32> to vector<16x16xf32>
    %85 = tpu.concatenate %81, %82, %83, %84 in 1 : vector<16x16xf32>, vector<16x16xf32>, vector<16x16xf32>, vector<16x16xf32> -> vector<16x64xf32>
    %c0_29 = arith.constant 0 : index
    %c0_30 = arith.constant 0 : index
    %c0_31 = arith.constant 0 : index
    %86 = vector.load %arg5[%c0_29, %c0_30, %c0_31] : memref<2x64x32xbf16, #tpu.memory_space<vmem>>, vector<1x64x32xbf16>
    %87 = vector.shape_cast %86 : vector<1x64x32xbf16> to vector<64x32xbf16>
    %88 = arith.truncf %85 : vector<16x64xf32> to vector<16x64xbf16>
    %cst_32 = arith.constant dense<0.000000e+00> : vector<16x32xf32>
    %89 = tpu.matmul %88, %87, %cst_32 {dimension_numbers = #tpu.dot_dimension_numbers<[1], [0], [0], [1], [0, 0, 1, 1], [], []>} : vector<16x64xbf16>, vector<64x32xbf16>, vector<16x32xf32> -> vector<16x32xf32>
    %90 = arith.addf %46, %89 : vector<16x32xf32>
    %c1 = arith.constant 1 : index
    %c0_33 = arith.constant 0 : index
    %c0_34 = arith.constant 0 : index
    %91 = vector.load %arg2[%c1, %c0_33, %c0_34] : memref<3x1x32xf32, #tpu.memory_space<vmem>>, vector<1x1x32xf32>
    %92 = vector.shape_cast %91 : vector<1x1x32xf32> to vector<1x32xf32>
    %cst_35 = arith.constant dense<0.000000e+00> : vector<16xf32>
    %93 = vector.multi_reduction <add>, %90, %cst_35 [1] : vector<16x32xf32> to vector<16xf32>
    %94 = vector.shape_cast %93 : vector<16xf32> to vector<16x1xf32>
    %cst_36 = arith.constant 3.200000e+01 : f32
    %95 = vector.broadcast %cst_36 : f32 to vector<16x1xf32>
    %96 = arith.divf %94, %95 : vector<16x1xf32>
    %97 = vector.broadcast %96 : vector<16x1xf32> to vector<16x32xf32>
    %98 = arith.subf %90, %97 : vector<16x32xf32>
    %99 = arith.mulf %98, %98 : vector<16x32xf32>
    %cst_37 = arith.constant dense<0.000000e+00> : vector<16xf32>
    %100 = vector.multi_reduction <add>, %99, %cst_37 [1] : vector<16x32xf32> to vector<16xf32>
    %101 = vector.shape_cast %100 : vector<16xf32> to vector<16x1xf32>
    %cst_38 = arith.constant 3.200000e+01 : f32
    %102 = vector.broadcast %cst_38 : f32 to vector<16x1xf32>
    %103 = arith.divf %101, %102 : vector<16x1xf32>
    %104 = vector.broadcast %96 : vector<16x1xf32> to vector<16x32xf32>
    %105 = arith.subf %90, %104 : vector<16x32xf32>
    %cst_39 = arith.constant 9.99999974E-6 : f32
    %106 = vector.broadcast %cst_39 : f32 to vector<16x1xf32>
    %107 = arith.addf %103, %106 : vector<16x1xf32>
    %108 = math.rsqrt %107 : vector<16x1xf32>
    %109 = vector.broadcast %108 : vector<16x1xf32> to vector<16x32xf32>
    %110 = arith.mulf %105, %109 : vector<16x32xf32>
    %111 = vector.broadcast %92 : vector<1x32xf32> to vector<16x32xf32>
    %112 = arith.mulf %110, %111 : vector<16x32xf32>
    %c1_40 = arith.constant 1 : index
    %c0_41 = arith.constant 0 : index
    %c0_42 = arith.constant 0 : index
    %113 = vector.load %arg3[%c1_40, %c0_41, %c0_42] : memref<2x32x512xbf16, #tpu.memory_space<vmem>>, vector<1x32x512xbf16>
    %114 = vector.shape_cast %113 : vector<1x32x512xbf16> to vector<32x512xbf16>
    %115 = arith.truncf %112 : vector<16x32xf32> to vector<16x32xbf16>
    %cst_43 = arith.constant dense<0.000000e+00> : vector<16x512xf32>
    %116 = tpu.matmul %115, %114, %cst_43 {dimension_numbers = #tpu.dot_dimension_numbers<[1], [0], [0], [1], [0, 0, 1, 1], [], []>} : vector<16x32xbf16>, vector<32x512xbf16>, vector<16x512xf32> -> vector<16x512xf32>
    %117 = vector.extract_strided_slice %116 {offsets = [0, 256], sizes = [16, 128], strides = [1, 1]} : vector<16x512xf32> to vector<16x128xf32>
    %118 = arith.negf %117 : vector<16x128xf32>
    %119 = math.exp %118 : vector<16x128xf32>
    %cst_44 = arith.constant 1.000000e+00 : f32
    %120 = vector.broadcast %cst_44 : f32 to vector<16x128xf32>
    %121 = arith.addf %120, %119 : vector<16x128xf32>
    %122 = arith.divf %120, %121 : vector<16x128xf32>
    %123 = arith.mulf %117, %122 : vector<16x128xf32>
    %124 = vector.extract_strided_slice %116 {offsets = [0, 128], sizes = [16, 128], strides = [1, 1]} : vector<16x512xf32> to vector<16x128xf32>
    %125 = arith.mulf %123, %124 : vector<16x128xf32>
    %c1_45 = arith.constant 1 : index
    %c0_46 = arith.constant 0 : index
    %c0_47 = arith.constant 0 : index
    %126 = vector.load %arg4[%c1_45, %c0_46, %c0_47] : memref<2x128x32xbf16, #tpu.memory_space<vmem>>, vector<1x128x32xbf16>
    %127 = vector.shape_cast %126 : vector<1x128x32xbf16> to vector<128x32xbf16>
    %128 = arith.truncf %125 : vector<16x128xf32> to vector<16x128xbf16>
    %cst_48 = arith.constant dense<0.000000e+00> : vector<16x32xf32>
    %129 = tpu.matmul %128, %127, %cst_48 {dimension_numbers = #tpu.dot_dimension_numbers<[1], [0], [0], [1], [0, 0, 1, 1], [], []>} : vector<16x128xbf16>, vector<128x32xbf16>, vector<16x32xf32> -> vector<16x32xf32>
    %130 = arith.addf %90, %129 : vector<16x32xf32>
    %131 = vector.extract_strided_slice %116 {offsets = [0, 0], sizes = [16, 64], strides = [1, 1]} : vector<16x512xf32> to vector<16x64xf32>
    %132 = arith.mulf %131, %2 : vector<16x64xf32>
    %133 = vector.extract_strided_slice %116 {offsets = [0, 64], sizes = [16, 64], strides = [1, 1]} : vector<16x512xf32> to vector<16x64xf32>
    %134 = arith.mulf %133, %3 : vector<16x64xf32>
    %135 = arith.addf %132, %134 : vector<16x64xf32>
    %136 = vector.extract_strided_slice %116 {offsets = [0, 384], sizes = [16, 16], strides = [1, 1]} : vector<16x512xf32> to vector<16x16xf32>
    %137 = arith.mulf %136, %4 : vector<16x16xf32>
    %138 = vector.extract_strided_slice %116 {offsets = [0, 400], sizes = [16, 16], strides = [1, 1]} : vector<16x512xf32> to vector<16x16xf32>
    %139 = arith.mulf %138, %5 : vector<16x16xf32>
    %140 = arith.addf %137, %139 : vector<16x16xf32>
    %141 = vector.extract_strided_slice %116 {offsets = [0, 416], sizes = [16, 16], strides = [1, 1]} : vector<16x512xf32> to vector<16x16xf32>
    %142 = vector.extract_strided_slice %135 {offsets = [0, 0], sizes = [16, 16], strides = [1, 1]} : vector<16x64xf32> to vector<16x16xf32>
    %143 = vector.extract_strided_slice %135 {offsets = [0, 16], sizes = [16, 16], strides = [1, 1]} : vector<16x64xf32> to vector<16x16xf32>
    %144 = vector.extract_strided_slice %135 {offsets = [0, 32], sizes = [16, 16], strides = [1, 1]} : vector<16x64xf32> to vector<16x16xf32>
    %145 = vector.extract_strided_slice %135 {offsets = [0, 48], sizes = [16, 16], strides = [1, 1]} : vector<16x64xf32> to vector<16x16xf32>
    %146 = tpu.concatenate %142, %143, %144, %145 in 0 : vector<16x16xf32>, vector<16x16xf32>, vector<16x16xf32>, vector<16x16xf32> -> vector<64x16xf32>
    %147 = tpu.transpose %140, [1, 0] : vector<16x16xf32> -> vector<16x16xf32>
    %148 = arith.truncf %146 : vector<64x16xf32> to vector<64x16xbf16>
    %149 = arith.truncf %147 : vector<16x16xf32> to vector<16x16xbf16>
    %cst_49 = arith.constant dense<0.000000e+00> : vector<64x16xf32>
    %150 = tpu.matmul %148, %149, %cst_49 {dimension_numbers = #tpu.dot_dimension_numbers<[1], [0], [0], [1], [0, 0, 1, 1], [], []>} : vector<64x16xbf16>, vector<16x16xbf16>, vector<64x16xf32> -> vector<64x16xf32>
    %151 = arith.addf %150, %6 : vector<64x16xf32>
    %cst_50 = arith.constant dense<0xFF800000> : vector<64xf32>
    %152 = vector.multi_reduction <maximumf>, %151, %cst_50 [1] : vector<64x16xf32> to vector<64xf32>
    %153 = vector.shape_cast %152 : vector<64xf32> to vector<64x1xf32>
    %154 = vector.broadcast %153 : vector<64x1xf32> to vector<64x16xf32>
    %155 = arith.subf %151, %154 : vector<64x16xf32>
    %156 = math.exp %155 : vector<64x16xf32>
    %cst_51 = arith.constant dense<0.000000e+00> : vector<64xf32>
    %157 = vector.multi_reduction <add>, %156, %cst_51 [1] : vector<64x16xf32> to vector<64xf32>
    %158 = vector.shape_cast %157 : vector<64xf32> to vector<64x1xf32>
    %159 = tpu.reciprocal %158 {approx = true} : vector<64x1xf32> -> vector<64x1xf32>
    %160 = vector.broadcast %159 : vector<64x1xf32> to vector<64x16xf32>
    %161 = arith.mulf %156, %160 : vector<64x16xf32>
    %162 = arith.truncf %161 : vector<64x16xf32> to vector<64x16xbf16>
    %163 = arith.truncf %141 : vector<16x16xf32> to vector<16x16xbf16>
    %cst_52 = arith.constant dense<0.000000e+00> : vector<64x16xf32>
    %164 = tpu.matmul %162, %163, %cst_52 {dimension_numbers = #tpu.dot_dimension_numbers<[1], [0], [0], [1], [0, 0, 1, 1], [], []>} : vector<64x16xbf16>, vector<16x16xbf16>, vector<64x16xf32> -> vector<64x16xf32>
    %165 = vector.extract_strided_slice %164 {offsets = [0, 0], sizes = [16, 16], strides = [1, 1]} : vector<64x16xf32> to vector<16x16xf32>
    %166 = vector.extract_strided_slice %164 {offsets = [16, 0], sizes = [16, 16], strides = [1, 1]} : vector<64x16xf32> to vector<16x16xf32>
    %167 = vector.extract_strided_slice %164 {offsets = [32, 0], sizes = [16, 16], strides = [1, 1]} : vector<64x16xf32> to vector<16x16xf32>
    %168 = vector.extract_strided_slice %164 {offsets = [48, 0], sizes = [16, 16], strides = [1, 1]} : vector<64x16xf32> to vector<16x16xf32>
    %169 = tpu.concatenate %165, %166, %167, %168 in 1 : vector<16x16xf32>, vector<16x16xf32>, vector<16x16xf32>, vector<16x16xf32> -> vector<16x64xf32>
    %c1_53 = arith.constant 1 : index
    %c0_54 = arith.constant 0 : index
    %c0_55 = arith.constant 0 : index
    %170 = vector.load %arg5[%c1_53, %c0_54, %c0_55] : memref<2x64x32xbf16, #tpu.memory_space<vmem>>, vector<1x64x32xbf16>
    %171 = vector.shape_cast %170 : vector<1x64x32xbf16> to vector<64x32xbf16>
    %172 = arith.truncf %169 : vector<16x64xf32> to vector<16x64xbf16>
    %cst_56 = arith.constant dense<0.000000e+00> : vector<16x32xf32>
    %173 = tpu.matmul %172, %171, %cst_56 {dimension_numbers = #tpu.dot_dimension_numbers<[1], [0], [0], [1], [0, 0, 1, 1], [], []>} : vector<16x64xbf16>, vector<64x32xbf16>, vector<16x32xf32> -> vector<16x32xf32>
    %174 = arith.addf %130, %173 : vector<16x32xf32>
    %c2 = arith.constant 2 : index
    %c0_57 = arith.constant 0 : index
    %c0_58 = arith.constant 0 : index
    %175 = vector.load %arg2[%c2, %c0_57, %c0_58] : memref<3x1x32xf32, #tpu.memory_space<vmem>>, vector<1x1x32xf32>
    %176 = vector.shape_cast %175 : vector<1x1x32xf32> to vector<1x32xf32>
    %cst_59 = arith.constant dense<0.000000e+00> : vector<16xf32>
    %177 = vector.multi_reduction <add>, %174, %cst_59 [1] : vector<16x32xf32> to vector<16xf32>
    %178 = vector.shape_cast %177 : vector<16xf32> to vector<16x1xf32>
    %cst_60 = arith.constant 3.200000e+01 : f32
    %179 = vector.broadcast %cst_60 : f32 to vector<16x1xf32>
    %180 = arith.divf %178, %179 : vector<16x1xf32>
    %181 = vector.broadcast %180 : vector<16x1xf32> to vector<16x32xf32>
    %182 = arith.subf %174, %181 : vector<16x32xf32>
    %183 = arith.mulf %182, %182 : vector<16x32xf32>
    %cst_61 = arith.constant dense<0.000000e+00> : vector<16xf32>
    %184 = vector.multi_reduction <add>, %183, %cst_61 [1] : vector<16x32xf32> to vector<16xf32>
    %185 = vector.shape_cast %184 : vector<16xf32> to vector<16x1xf32>
    %cst_62 = arith.constant 3.200000e+01 : f32
    %186 = vector.broadcast %cst_62 : f32 to vector<16x1xf32>
    %187 = arith.divf %185, %186 : vector<16x1xf32>
    %188 = vector.broadcast %180 : vector<16x1xf32> to vector<16x32xf32>
    %189 = arith.subf %174, %188 : vector<16x32xf32>
    %cst_63 = arith.constant 9.99999974E-6 : f32
    %190 = vector.broadcast %cst_63 : f32 to vector<16x1xf32>
    %191 = arith.addf %187, %190 : vector<16x1xf32>
    %192 = math.rsqrt %191 : vector<16x1xf32>
    %193 = vector.broadcast %192 : vector<16x1xf32> to vector<16x32xf32>
    %194 = arith.mulf %189, %193 : vector<16x32xf32>
    %195 = vector.broadcast %176 : vector<1x32xf32> to vector<16x32xf32>
    %196 = arith.mulf %194, %195 : vector<16x32xf32>
    %c0_64 = arith.constant 0 : index
    %c0_65 = arith.constant 0 : index
    %197 = vector.load %arg6[%c0_64, %c0_65] : memref<32x256xbf16, #tpu.memory_space<vmem>>, vector<32x256xbf16>
    %198 = arith.truncf %196 : vector<16x32xf32> to vector<16x32xbf16>
    %cst_66 = arith.constant dense<0.000000e+00> : vector<16x256xf32>
    %199 = tpu.matmul %198, %197, %cst_66 {dimension_numbers = #tpu.dot_dimension_numbers<[1], [0], [0], [1], [0, 0, 1, 1], [], []>} : vector<16x32xbf16>, vector<32x256xbf16>, vector<16x256xf32> -> vector<16x256xf32>
    %c0_67 = arith.constant 0 : index
    %c0_68 = arith.constant 0 : index
    %c0_69 = arith.constant 0 : index
    %200 = vector.load %arg9[%c0_67, %c0_68, %c0_69] : memref<1x16x256xf32, #tpu.memory_space<vmem>>, vector<1x16x256xf32>
    %201 = vector.shape_cast %200 : vector<1x16x256xf32> to vector<16x256xf32>
    %202 = vector.shape_cast %199 : vector<16x256xf32> to vector<1x16x256xf32>
    tpu.vector_store %arg9[%c0_67, %c0_68, %c0_69], %202 {strides = array<i32>} : memref<1x16x256xf32, #tpu.memory_space<vmem>>, vector<1x16x256xf32>,
    return
  }
  func.func @transform_0(%arg0: i32) -> (i32, i32, i32) {
    %c0_i32 = arith.constant 0 : i32
    %c0_i32_0 = arith.constant 0 : i32
    %c0_i32_1 = arith.constant 0 : i32
    return %arg0, %c0_i32, %c0_i32_0 : i32, i32, i32
  }
  func.func @transform_1(%arg0: i32) -> (i32, i32, i32) {
    %c0_i32 = arith.constant 0 : i32
    %c0_i32_0 = arith.constant 0 : i32
    %c0_i32_1 = arith.constant 0 : i32
    %c0_i32_2 = arith.constant 0 : i32
    return %c0_i32, %c0_i32_0, %c0_i32_1 : i32, i32, i32
  }
  func.func @transform_2(%arg0: i32) -> (i32, i32, i32) {
    %c0_i32 = arith.constant 0 : i32
    %c0_i32_0 = arith.constant 0 : i32
    %c0_i32_1 = arith.constant 0 : i32
    %c0_i32_2 = arith.constant 0 : i32
    return %c0_i32, %c0_i32_0, %c0_i32_1 : i32, i32, i32
  }
  func.func @transform_3(%arg0: i32) -> (i32, i32, i32) {
    %c0_i32 = arith.constant 0 : i32
    %c0_i32_0 = arith.constant 0 : i32
    %c0_i32_1 = arith.constant 0 : i32
    %c0_i32_2 = arith.constant 0 : i32
    return %c0_i32, %c0_i32_0, %c0_i32_1 : i32, i32, i32
  }
  func.func @transform_4(%arg0: i32) -> (i32, i32, i32) {
    %c0_i32 = arith.constant 0 : i32
    %c0_i32_0 = arith.constant 0 : i32
    %c0_i32_1 = arith.constant 0 : i32
    %c0_i32_2 = arith.constant 0 : i32
    return %c0_i32, %c0_i32_0, %c0_i32_1 : i32, i32, i32
  }
  func.func @transform_5(%arg0: i32) -> (i32, i32) {
    %c0_i32 = arith.constant 0 : i32
    %c0_i32_0 = arith.constant 0 : i32
    %c0_i32_1 = arith.constant 0 : i32
    return %c0_i32, %c0_i32_0 : i32, i32
  }
  func.func @transform_6(%arg0: i32) -> (i32, i32) {
    %c0_i32 = arith.constant 0 : i32
    %c0_i32_0 = arith.constant 0 : i32
    %c0_i32_1 = arith.constant 0 : i32
    return %c0_i32, %c0_i32_0 : i32, i32
  }
  func.func @transform_7(%arg0: i32) -> (i32, i32) {
    %c0_i32 = arith.constant 0 : i32
    %c0_i32_0 = arith.constant 0 : i32
    %c0_i32_1 = arith.constant 0 : i32
    return %c0_i32, %c0_i32_0 : i32, i32
  }
  func.func @transform_8(%arg0: i32) -> (i32, i32, i32) {
    %c0_i32 = arith.constant 0 : i32
    %c0_i32_0 = arith.constant 0 : i32
    %c0_i32_1 = arith.constant 0 : i32
    return %arg0, %c0_i32, %c0_i32_0 : i32, i32, i32
  }
}

</mosaic_0001>

<bundles_post_ra>
// kernel: tile.60
= control target key start
LH: loop header
LB: loop body
LE: loop exit
PB: predicated region body
PF: predicated region fallthrough
CT: control target
= control target key end

     0   :  { %vm82_vm0 = vcmask 1047556   ;;  %vm84_vm1 = vcmask 130048   ;;  %s195_s9 = smov 48   ;;  %s196_s14 = smov 16   ;;  %vm103_vm2 = vcmask 523648   ;;  %vm124_vm3 = vcmask 392448   ;;  %s289_s0 = inlined_call_operand.vmem [shape: f32[16,4,16], index: 0, kind: input, shape index: {}]   ;;  %s290_s1 = inlined_call_operand.vmem [shape: f32[16,64], index: 1, kind: output, shape index: {}]  }
   0x1   :  { %v180_v0 = vld [vmem:[%s289_s0 + $0x1c] sm:$0xf]  ;;  %v181_v1 = vld [vmem:[%s289_s0 + $0x18] sm:$0xf]  ;;  %v182_v2 = vld [vmem:[%s289_s0 + $0x14] sm:$0xf] }
   0x2   :  { %48 = vst [vmem:[#allocation0 + $0x38] sm:$0xf] %v180_v0  ;;  %53 = vst [vmem:[#allocation0 + $0x30] sm:$0xf] %v181_v1  ;;  %v183_v3 = vld [vmem:[%s289_s0 + $0x10] sm:$0xf] }
   0x3   :  { %58 = vst [vmem:[#allocation0 + $0x28] sm:$0xf] %v182_v2  ;;  %v184_v4 = vld [vmem:[%s289_s0 + $0xc] sm:$0xf]  ;;  %v185_v5 = vld [vmem:[%s289_s0 + $0x8] sm:$0xf] }
   0x4   :  { %63 = vst [vmem:[#allocation0 + $0x20] sm:$0xf] %v183_v3  ;;  %68 = vst [vmem:[#allocation0 + $0x18] sm:$0xf] %v184_v4  ;;  %v186_v6 = vld [vmem:[%s289_s0 + $0x4] sm:$0xf] }
   0x5   :  { %73 = vst [vmem:[#allocation0 + $0x10] sm:$0xf] %v185_v5  ;;  %v78_v7 = vld [vmem:[%s289_s0] sm:$0xf]  ;;  %77 = vst [vmem:[#allocation0 + $0x8] sm:$0xf] %v186_v6 }
   0x6   :  { %79 = vst [vmem:[#allocation0] sm:$0xf] %v78_v7  ;;  %v172_v8 = vld [vmem:[%s289_s0 + $0x3c] sm:$0xf]  ;;  %v173_v9 = vld [vmem:[%s289_s0 + $0x38] sm:$0xf] }
   0x7   :  { %8 = vst [vmem:[#allocation0 + $0x78] sm:$0xf] %v172_v8  ;;  %13 = vst [vmem:[#allocation0 + $0x70] sm:$0xf] %v173_v9  ;;  %v174_v10 = vld [vmem:[%s289_s0 + $0x34] sm:$0xf] }
   0x8   :  { %v175_v11 = vld [vmem:[%s289_s0 + $0x30] sm:$0xf]  ;;  %v176_v12 = vld [vmem:[%s289_s0 + $0x2c] sm:$0xf]  ;;  %18 = vst [vmem:[#allocation0 + $0x68] sm:$0xf] %v174_v10 }
   0x9   :  { %23 = vst [vmem:[#allocation0 + $0x60] sm:$0xf] %v175_v11  ;;  %28 = vst [vmem:[#allocation0 + $0x58] sm:$0xf] %v176_v12  ;;  %v177_v13 = vld [vmem:[%s289_s0 + $0x28] sm:$0xf] }
   0xa   :  { %v178_v14 = vld [vmem:[%s289_s0 + $0x24] sm:$0xf]  ;;  %v179_v15 = vld [vmem:[%s289_s0 + $0x20] sm:$0xf]  ;;  %33 = vst [vmem:[#allocation0 + $0x50] sm:$0xf] %v177_v13 }
   0xb   :  { %38 = vst [vmem:[#allocation0 + $0x48] sm:$0xf] %v178_v14  ;;  %43 = vst [vmem:[#allocation0 + $0x40] sm:$0xf] %v179_v15  ;;  %s194_s0 = smov 32   ;;  %vm145_vm4 = vcmask 261248  }
   0xc   :  { %v119_v16 = vld [vmem:[#allocation0 + $0x2] ss:$8 sm:$0xf0]   ;;  %v98_v17 = vld [vmem:[#allocation0 + $0x3] ss:$8 sm:$0xf0]  }
   0xd   :  { %v117_v18 = vld [vmem:[#allocation0 + $0x2] ss:$8 sm:$0xf]   ;;  %v96_v19 = vld [vmem:[#allocation0 + $0x3] ss:$8 sm:$0xf]  }
   0xe   :  { %v121_v20 = vsel %vm82_vm0, %v119_v16, %v117_v18  ;;  %v100_v21 = vsel %vm82_vm0, %v98_v17, %v96_v19  ;;  %v138_v24 = vld [vmem:[#allocation0 + $0x1] ss:$8 sm:$0xf]   ;;  %v80_v32 = vld [vmem:[#allocation0] ss:$8 sm:$0xf]  }
   0xf   :  { %122 = vrot.lane.b32.xlu1 %v121_v20, %s194_s0  ;;  %101 = vrot.lane.b32.xlu0 %v100_v21, %s195_s9  ;;  %v140_v25 = vld [vmem:[#allocation0 + $0x1] ss:$8 sm:$0xf0]   ;;  %v81_v33 = vld [vmem:[#allocation0] ss:$8 sm:$0xf0]  }
  0x10   :  { %v129_v22 = vld [vmem:[#allocation0 + $0x42] ss:$8 sm:$0xf0]   ;;  %v108_v23 = vld [vmem:[#allocation0 + $0x43] ss:$8 sm:$0xf0]   ;;  %v83_v34 = vsel %vm82_vm0, %v81_v33, %v80_v32  ;;  %v142_v38 = vsel %vm82_vm0, %v140_v25, %v138_v24 }
  0x11   :  { %v150_v31 = vld [vmem:[#allocation0 + $0x41] ss:$8 sm:$0xf0]   ;;  %v89_v36 = vld [vmem:[#allocation0 + $0x40] ss:$8 sm:$0xf0]  }
  0x12   :  { %v127_v26 = vld [vmem:[#allocation0 + $0x42] ss:$8 sm:$0xf]   ;;  %v106_v27 = vld [vmem:[#allocation0 + $0x43] ss:$8 sm:$0xf]  }
  0x13   :  { %v131_v28 = vsel %vm82_vm0, %v129_v22, %v127_v26  ;;  %v110_v29 = vsel %vm82_vm0, %v108_v23, %v106_v27  ;;  %v148_v30 = vld [vmem:[#allocation0 + $0x41] ss:$8 sm:$0xf]   ;;  %v87_v35 = vld [vmem:[#allocation0 + $0x40] ss:$8 sm:$0xf]  }
  0x14   :  { %132 = vrot.lane.b32.xlu1 %v131_v28, %s194_s0  ;;  %111 = vrot.lane.b32.xlu0 %v110_v29, %s195_s9  ;;  %v152_v37 = vsel %vm82_vm0, %v150_v31, %v148_v30  ;;  %85 = vst.msk [vmem:[%s290_s1] sm:$0xff] %vm84_vm1, %v83_v34   ;;  %v91_v39 = vsel %vm82_vm0, %v89_v36, %v87_v35 }
  0x15   :  { %187 = vst.msk [vmem:[%s290_s1 + $0x8] sm:$0xff] %vm84_vm1, %v91_v39  }
  0x18   :  { %153 = vrot.lane.b32.xlu1 %v152_v37, %s196_s14  ;;  %143 = vrot.lane.b32.xlu0 %v142_v38, %s196_s14 }
  0x81   :  { %v123_v40 = vpop.permute.xlu1 %122   ;;  %v102_v41 = vpop.permute.xlu0 %101  }
  0x82   :  { %104 = vst.msk [vmem:[%s290_s1] sm:$0xff] %vm103_vm2, %v102_v41  }
  0x83   :  { %125 = vst.msk [vmem:[%s290_s1] sm:$0xff] %vm124_vm3, %v123_v40  }
  0x86   :  { %v133_v42 = vpop.permute.xlu1 %132   ;;  %v112_v43 = vpop.permute.xlu0 %111  }
  0x87   :  { %188 = vst.msk [vmem:[%s290_s1 + $0x8] sm:$0xff] %vm103_vm2, %v112_v43  }
  0x88   :  { %189 = vst.msk [vmem:[%s290_s1 + $0x8] sm:$0xff] %vm124_vm3, %v133_v42  }
  0x8a   :  { %v154_v44 = vpop.permute.xlu1 %153   ;;  %v144_v45 = vpop.permute.xlu0 %143  }
  0x8b   :  { %190 = vst.msk [vmem:[%s290_s1 + $0x8] sm:$0xff] %vm145_vm4, %v154_v44   ;;  %146 = vst.msk [vmem:[%s290_s1] sm:$0xff] %vm145_vm4, %v144_v45  }

// kernel: actor_forward.1
= control target key start
LH: loop header
LB: loop body
LE: loop exit
PB: predicated region body
PF: predicated region fallthrough
CT: control target
= control target key end

     0   :  { %vm46_vm0 = vcmask 261120   ;;  %s2662_s0 = inlined_call_operand.vmem [shape: f32[1,16,32], index: 0, kind: input, shape index: {}]   ;;  %s2663_s1 = inlined_call_operand.vmem [shape: f32[3,1,32], index: 1, kind: input, shape index: {}]   ;;  %s2664_s2 = inlined_call_operand.vmem [shape: bf16[2,32,512], index: 2, kind: input, shape index: {}]   ;;  %s2665_s3 = inlined_call_operand.vmem [shape: bf16[2,128,32], index: 3, kind: input, shape index: {}]   ;;  %s2666_s4 = inlined_call_operand.vmem [shape: bf16[2,64,32], index: 4, kind: input, shape index: {}]   ;;  %s2667_s5 = inlined_call_operand.vmem [shape: bf16[32,256], index: 5, kind: input, shape index: {}]   ;;  %s2668_s6 = inlined_call_operand.vmem [shape: f32[16,160], index: 6, kind: input, shape index: {}]   ;;  %s2669_s7 = inlined_call_operand.vmem [shape: f32[64,16], index: 7, kind: input, shape index: {}]   ;;  %s2670_s8 = inlined_call_operand.hbm [shape: f32[1,16,256], index: 8, kind: output, shape index: {}]  }
   0x1   :  { %v2233_v0 = vld [vmem:[%s2662_s0] sm:$0xff]  ;;  %v2238_v1 = vld [vmem:[%s2662_s0 + $0x8] sm:$0xff] }
   0x2   :  { %v47_v2 = vsel %vm46_vm0, %v2233_v0, 0.0  ;;  %v50_v3 = vsel %vm46_vm0, %v2238_v1, 0.0 }
   0x3   :  { %48 = vadd.xlane.f32.xlu0 %v47_v2 }
   0x7   :  { %51 = vadd.xlane.f32.xlu0 %v50_v3 }
   0x8   :  { %13 = vsyncpa [#allocation3], 0  ;;  %v2001_v14 = vld [vmem:[%s2664_s2 + $0x4] ss:$16 sps:$4 sm:$0xff]   ;;  %v2003_v15 = vld [vmem:[%s2664_s2 + $0xc] ss:$16 sps:$4 sm:$0xff]  }
   0x9   :  { %v2005_v16 = vld [vmem:[%s2664_s2] ss:$16 sps:$4 sm:$0xff]   ;;  %v2006_v17 = vld [vmem:[%s2664_s2 + $0x8] ss:$16 sps:$4 sm:$0xff]   ;;  %v2007_v18 = vld [vmem:[%s2664_s2 + $0x24] ss:$16 sps:$4 sm:$0xff]   ;;  %134 = vmatprep.subr.bf16.mxu0 %v2001_v14  ;;  %177 = vmatprep.subr.bf16.mxu1 %v2003_v15 }
   0xa   :  { %v2009_v19 = vld [vmem:[%s2664_s2 + $0x2c] ss:$16 sps:$4 sm:$0xff]   ;;  %135 = vmatpush1.bf16.msra.mxu0 %v2005_v16  ;;  %178 = vmatpush1.bf16.msra.mxu1 %v2006_v17  ;;  %v2011_v20 = vld [vmem:[%s2664_s2 + $0x20] ss:$16 sps:$4 sm:$0xff]   ;;  %v2012_v21 = vld [vmem:[%s2664_s2 + $0x28] ss:$16 sps:$4 sm:$0xff]  }
   0xb   :  { %136 = vmatprep.subr.bf16.mxu0 %v2007_v18  ;;  %179 = vmatprep.subr.bf16.mxu1 %v2009_v19  ;;  %v2173_v22 = vmov 0   ;;  %v1657_v32 = vld [vmem:[%s2663_s1] ss:$0 sm:$0xff]  ;;  %v2174_v38 = vmov 0.0   ;;  %v2014_v39 = vld [vmem:[%s2665_s3 + $0x8] sm:$0xff]   ;;  %v2015_v40 = vld [vmem:[%s2665_s3 + $0x10] sm:$0xff]  }
   0xc   :  { %166 = vmatprep.mubr.bf16.mxu0 %v2173_v22  ;;  %209 = vmatprep.mubr.bf16.mxu1 %v2173_v22  ;;  %v2013_v37 = vld [vmem:[%s2665_s3] sm:$0xff]   ;;  %v2016_v41 = vld [vmem:[%s2665_s3 + $0x18] sm:$0xff]   ;;  %v2018_v43 = vld [vmem:[%s2665_s3 + $0x28] sm:$0xff]   ;;  %vm2175_vm1 = vmmov 0   ;;  %s2176_s25 = smov 64   ;;  %s2177_s30 = smov 112  }
   0xd   :  { %v2017_v42 = vld [vmem:[%s2665_s3 + $0x20] sm:$0xff]   ;;  %v2019_v44 = vld [vmem:[%s2665_s3 + $0x30] sm:$0xff]   ;;  %v2020_v45 = vld [vmem:[%s2665_s3 + $0x38] sm:$0xff]   ;;  %vm425_vm2 = vcmask 130048   ;;  %s2179_s9 = smov 80   ;;  %s2180_s10 = smov 16  }
   0xe   :  { %137 = vmatpush1.bf16.msra.mxu0 %v2011_v20  ;;  %180 = vmatpush1.bf16.msra.mxu1 %v2012_v21  ;;  %v2317_v46 = vld [vmem:[%s2668_s6] sm:$0xff]  ;;  %v2322_v49 = vld [vmem:[%s2668_s6 + $0x10] sm:$0xff]  ;;  %v2334_v60 = vld [vmem:[%s2668_s6 + $0x8] sm:$0xff]  ;;  %s2181_s15 = smov 32   ;;  %s2182_s16 = smov 48   ;;  %vm705_vm3 = vcmask 392192  }
   0xf   :  { %1813 = vmatprep.subr.bf16.mxu0 %v2174_v38  ;;  %v2344_v63 = vld [vmem:[%s2668_s6 + $0x18] sm:$0xff]  ;;  %s2178_s6 = smov 96   ;;  %vm741_vm4 = vcmask 523264  }
  0x90   :  { %v49_v4 = vpop.xlane.xlu0 %48 }
  0x91   :  { %v54_v5 = vmul.f32 0.03125, %v49_v4 }
  0x93   :  { %v56_v6 = vsub.f32 %v2233_v0, %v54_v5 }
  0x94   :  { %v52_v7 = vpop.xlane.xlu0 %51 }
  0x95   :  { %v55_v8 = vmul.f32 0.03125, %v52_v7  ;;  %v58_v9 = vmul.f32 %v56_v6, %v56_v6 }
  0x97   :  { %v57_v10 = vsub.f32 %v2238_v1, %v55_v8  ;;  %v60_v11 = vsel %vm46_vm0, %v58_v9, 0.0 }
  0x98   :  { %61 = vadd.xlane.f32.xlu1 %v60_v11 }
  0x99   :  { %v59_v12 = vmul.f32 %v57_v10, %v57_v10 }
  0x9b   :  { %v63_v13 = vsel %vm46_vm0, %v59_v12, 0.0 }
  0x9c   :  { %64 = vadd.xlane.f32.xlu1 %v63_v13 }
 0x125   :  { %v62_v23 = vpop.xlane.xlu1 %61 }
 0x126   :  { %v66_v24 = vmul.f32 0.03125, %v62_v23 }
 0x128   :  { %v68_v25 = vadd.f32 1e-05, %v66_v24 }
 0x129   :  { %v65_v26 = vpop.xlane.xlu1 %64 }
 0x12a   :  { %2055 = vrsqrt.f32 %v68_v25  ;;  %v67_v27 = vmul.f32 0.03125, %v65_v26 }
 0x12c   :  { %v69_v28 = vadd.f32 1e-05, %v67_v27 }
 0x12e   :  { %2057 = vrsqrt.f32 %v69_v28 }
 0x134   :  { %v2056_v29 = vpop.eup %2055 }
 0x135   :  { %v72_v30 = vmul.f32 %v2056_v29, %v56_v6 }
 0x137   :  { %v80_v34 = vmul.f32 %v1657_v32, %v72_v30 }
 0x138   :  { %v2058_v31 = vpop.eup %2057 }
 0x139   :  { %v73_v33 = vmul.f32 %v2058_v31, %v57_v10 }
 0x13b   :  { %v81_v35 = vmul.f32 %v1657_v32, %v73_v33 }
 0x13d   :  { %v90_v36 = vpack.c.bf16 %v81_v35, %v80_v34 }
 0x13f   :  { %1666 = vmatmul.mubr.msk.bf16.vlgmr.msra.gmra.mrb[0].mxu0 %vm46_vm0, %v90_v36  ;;  %1667 = vmatmul.mubr.msk.bf16.vlgmr.msra.gmra.mrb[0].mxu1 %vm46_vm0, %v90_v36 }
 0x140   :  { %1814 = vmatpush3.bf16.msra.mxu0 %v2013_v37  ;;  %1829 = vmatprep.mubr.msk.bf16.mxu0 %vm2175_vm1, %v2174_v38 }
 0x141   :  { %1815 = vmatprep.subr.bf16.mxu0 %v2174_v38 }
 0x144   :  { %1816 = vmatpush3.bf16.msra.mxu0 %v2014_v39 }
 0x145   :  { %1817 = vmatprep.subr.bf16.mxu0 %v2174_v38 }
 0x148   :  { %1818 = vmatpush3.bf16.msra.mxu0 %v2015_v40 }
 0x149   :  { %1819 = vmatprep.subr.bf16.mxu0 %v2174_v38 }
 0x14c   :  { %1820 = vmatpush3.bf16.msra.mxu0 %v2016_v41  ;;  %v2362_v41 = vld [vmem:[%s2669_s7 + $0x10] sm:$0xff] }
 0x14d   :  { %1821 = vmatprep.subr.bf16.mxu0 %v2174_v38 }
 0x150   :  { %1822 = vmatpush3.bf16.msra.mxu0 %v2017_v42 }
 0x151   :  { %1823 = vmatprep.subr.bf16.mxu0 %v2174_v38 }
 0x154   :  { %1824 = vmatpush3.bf16.msra.mxu0 %v2018_v43  ;;  %v2367_v43 = vld [vmem:[%s2669_s7] sm:$0xff] }
 0x155   :  { %1825 = vmatprep.subr.bf16.mxu0 %v2174_v38 }
 0x158   :  { %1826 = vmatpush3.bf16.msra.mxu0 %v2019_v44 }
 0x159   :  { %1827 = vmatprep.subr.bf16.mxu0 %v2174_v38 }
 0x15c   :  { %1828 = vmatpush3.bf16.msra.mxu0 %v2020_v45 }
 0x15d   :  { %1853 = vmatprep.subr.bf16.mxu0 %v2174_v38 }
 0x212   :  { %v168_v47 = vpop.f32.mrb[0].mxu0  ;;  %v211_v48 = vpop.f32.mrb[0].mxu1 }
 0x213   :  { %v344_v50 = vmul.f32 %v168_v47, %v2317_v46  ;;  %v1668_v51 = vmul.f32 -1.442695, %v211_v48  ;;  %v170_v52 = vpop.f32.mrb[1].mxu0  ;;  %v2325_v53 = vpop.f32.mrb[1].mxu1 }
 0x214   :  { %v172_v54 = vpop.f32.mrb[2].mxu0  ;;  %v215_v55 = vpop.f32.mrb[2].mxu1  ;;  %v356_v62 = vmul.f32 %v2325_v53, %v2334_v60 }
 0x215   :  { %2059 = vpow2.f32 %v1668_v51  ;;  %v345_v56 = vmul.f32 %v172_v54, %v2322_v49  ;;  %v1669_v57 = vmul.f32 -1.442695, %v215_v55  ;;  %v2328_v58 = vpop.f32.mrb[3].mxu1  ;;  %348 = vrot.lane.b32.xlu0 %v344_v50, %s2176_s25  ;;  %v174_v59 = vpop.f32.mrb[3].mxu0 }
 0x216   :  { %v595_v61 = vpack.c.bf16 %v2328_v58, %v2325_v53  ;;  %v357_v2 = vmul.f32 %v2328_v58, %v2344_v63 }
 0x217   :  { %2061 = vpow2.f32 %v1669_v57  ;;  %350 = vrot.lane.b32.xlu1 %v345_v56, %s2176_s25 }
 0x21b   :  { %360 = vrot.lane.b32.xlu1 %v356_v62, %s2177_s30 }
 0x21f   :  { %v2060_v3 = vpop.eup %2059  ;;  %362 = vrot.lane.b32.xlu1 %v357_v2, %s2177_s30 }
 0x220   :  { %v226_v4 = vadd.f32 1.0, %v2060_v3 }
 0x221   :  { %v2062_v5 = vpop.eup %2061 }
 0x222   :  { %2063 = vrcp.f32 %v226_v4  ;;  %v227_v6 = vadd.f32 1.0, %v2062_v5 }
 0x224   :  { %2065 = vrcp.f32 %v227_v6  ;;  %v2394_v6 = vld [vmem:[%s2669_s7 + $0x20] sm:$0xff] }
 0x22c   :  { %v2064_v7 = vpop.eup %2063 }
 0x22d   :  { %v232_v8 = vmul.f32 %v2064_v7, %v211_v48 }
 0x22e   :  { %v2066_v9 = vpop.eup %2065 }
 0x22f   :  { %v234_v10 = vmul.f32 %v232_v8, %v170_v52  ;;  %v233_v11 = vmul.f32 %v2066_v9, %v215_v55  ;;  %v2375_v52 = vld [vmem:[%s2669_s7 + $0x18] sm:$0xff] }
 0x231   :  { %v235_v12 = vmul.f32 %v233_v11, %v174_v59  ;;  %v2403_v11 = vld [vmem:[%s2669_s7 + $0x30] sm:$0xff] }
 0x233   :  { %v252_v13 = vpack.c.bf16 %v235_v12, %v234_v10 }
 0x235   :  { %1830 = vmatmul.mubr.bf16.vlgmr.msra.gmra.mrb[4].mxu0 %v252_v13 }
 0x236   :  { %1861 = vmatprep.mubr.msk.bf16.mxu0 %vm2175_vm1, %v2174_v38 }
 0x287   :  { %v349_v14 = vpop.permute.xlu0 %348 }
 0x288   :  { %v354_v16 = vadd.f32 %v349_v14, %v344_v50  ;;  %v2410_v14 = vld [vmem:[%s2669_s7 + $0x38] sm:$0xff] }
 0x289   :  { %v351_v15 = vpop.permute.xlu1 %350 }
 0x28a   :  { %v355_v17 = vadd.f32 %v351_v15, %v345_v56  ;;  %v2382_v56 = vld [vmem:[%s2669_s7 + $0x8] sm:$0xff] }
 0x28c   :  { %v1946_v18 = vpack.i.bf16 %v355_v17, %v354_v16  ;;  %v420_v19 = vpack.c.bf16 %v355_v17, %v354_v16 }
 0x28d   :  { %v361_v20 = vpop.permute.xlu1 %360 }
 0x28e   :  { %1947 = vrot.lane.b32.xlu1 %v1946_v18, %s2178_s6  ;;  %1942 = vrot.lane.b32.xlu0 %v1946_v18, %s2177_s30  ;;  %v366_v21 = vadd.f32 %v361_v20, %v356_v62  ;;  %v2387_v62 = vld [vmem:[%s2669_s7 + $0x28] sm:$0xff] }
 0x28f   :  { %1835 = vmatprep.mubr.msk.bf16.mxu1 %vm425_vm2, %v420_v19 }
 0x291   :  { %v363_v23 = vpop.permute.xlu1 %362 }
 0x292   :  { %1952 = vrot.lane.b32.xlu0 %v1946_v18, %s2179_s9  ;;  %v367_v24 = vadd.f32 %v363_v23, %v357_v2 }
 0x2b7   :  { %388 = vxpose.xlu1.b32.start [1/2] (short) (narrow) %v366_v21, 16 }
 0x2bb   :  { %389 = vxpose.xlu1.b32.end [2/2] (short) (narrow) %v367_v24, 16 }
 0x300   :  { %v1948_v25 = vpop.permute.xlu1 %1947  ;;  %v1943_v27 = vpop.permute.xlu0 %1942 }
 0x301   :  { %v1945_v29 = vunpack.i.h.bf16 %v1943_v27  ;;  %v1944_v30 = vunpack.i.l.bf16 %v1943_v27  ;;  %v1950_v32 = vunpack.i.h.bf16 %v1948_v25  ;;  %v1949_v33 = vunpack.i.l.bf16 %v1948_v25 }
 0x303   :  { %v421_v34 = vpack.c.bf16 %v1945_v29, %v1944_v30  ;;  %v422_v35 = vpack.c.bf16 %v1950_v32, %v1949_v33 }
 0x304   :  { %v1953_v36 = vpop.permute.xlu0 %1952 }
 0x305   :  { %v1955_v37 = vunpack.i.h.bf16 %v1953_v36  ;;  %v1954_v39 = vunpack.i.l.bf16 %v1953_v36 }
 0x307   :  { %v423_v40 = vpack.c.bf16 %v1955_v37, %v1954_v39 }
 0x337   :  { %v404_v26 = vpop.trf.xlu1 }
 0x33b   :  { %v405_v28 = vpop.trf.xlu1 }
 0x33c   :  { %v424_v31 = vpack.c.bf16 %v405_v28, %v404_v26 }
 0x33e   :  { %1833 = vmatprep.subr.bf16.mxu1 %v424_v31 }
 0x33f   :  { %1834 = vmatpush3.bf16.msra.mxu1 %v424_v31 }
 0x342   :  { %1836 = vmatmul.mubr.msk.bf16.vlgmr.msra.gmra.mrb[4].mxu1 %vm425_vm2, %v421_v34 }
 0x343   :  { %1839 = vmatprep.mubr.msk.bf16.mxu1 %vm425_vm2, %v422_v35 }
 0x34a   :  { %1840 = vmatmul.mubr.msk.bf16.gmra.mrb[8].mxu1 %vm425_vm2, %v423_v40 }
 0x415   :  { %v1837_v42 = vpop.f32.mrb[4].mxu1 }
 0x416   :  { %v481_v44 = vadd.f32 %v1837_v42, %v2362_v41  ;;  %v472_v45 = vpop.f32.mrb[5].mxu1 }
 0x417   :  { %v1838_v47 = vpop.f32.mrb[6].mxu1  ;;  %v473_v48 = vadd.f32 %v472_v45, %v2367_v43 }
 0x418   :  { %v475_v50 = vpop.f32.mrb[7].mxu1  ;;  %v509_v51 = vsel %vm425_vm2, %v481_v44, -inf  ;;  %v484_v54 = vadd.f32 %v1838_v47, %v2375_v52 }
 0x419   :  { %510 = vmax.xlane.f32.xlu0 %v509_v51  ;;  %v503_v55 = vsel %vm425_vm2, %v473_v48, -inf  ;;  %v476_v3 = vadd.f32 %v475_v50, %v2382_v56 }
 0x41a   :  { %v512_v5 = vsel %vm425_vm2, %v484_v54, -inf }
 0x41b   :  { %v506_v10 = vsel %vm425_vm2, %v476_v3, -inf }
 0x41d   :  { %504 = vmax.xlane.f32.xlu0 %v503_v55  ;;  %v1841_v57 = vpop.f32.mrb[8].mxu1 }
 0x41e   :  { %v488_v59 = vpop.f32.mrb[9].mxu1  ;;  %v497_v12 = vadd.f32 %v1841_v57, %v2403_v11 }
 0x41f   :  { %v1842_v2 = vpop.f32.mrb[10].mxu1  ;;  %v489_v9 = vadd.f32 %v488_v59, %v2394_v6 }
 0x420   :  { %v491_v4 = vpop.f32.mrb[11].mxu1  ;;  %v500_v15 = vadd.f32 %v1842_v2, %v2410_v14  ;;  %v521_v16 = vsel %vm425_vm2, %v497_v12, -inf }
 0x421   :  { %v492_v7 = vadd.f32 %v491_v4, %v2387_v62  ;;  %513 = vmax.xlane.f32.xlu0 %v512_v5  ;;  %v515_v13 = vsel %vm425_vm2, %v489_v9, -inf }
 0x422   :  { %v524_v17 = vsel %vm425_vm2, %v500_v15, -inf }
 0x423   :  { %v518_v8 = vsel %vm425_vm2, %v492_v7, -inf }
 0x424   :  { %519 = vmax.xlane.f32.xlu1 %v518_v8 }
 0x425   :  { %507 = vmax.xlane.f32.xlu0 %v506_v10 }
 0x429   :  { %516 = vmax.xlane.f32.xlu0 %v515_v13 }
 0x42d   :  { %522 = vmax.xlane.f32.xlu0 %v521_v16 }
 0x431   :  { %525 = vmax.xlane.f32.xlu0 %v524_v17 }
 0x435   :  { %597 = vrot.lane.b32.xlu1 %v595_v61, %s2178_s6 }
 0x4a6   :  { %v511_v18 = vpop.xlane.xlu0 %510 }
 0x4a7   :  { %v529_v19 = vsub.f32 %v481_v44, %v511_v18 }
 0x4a9   :  { %v539_v20 = vmul.f32 1.442695, %v529_v19 }
 0x4aa   :  { %v505_v21 = vpop.xlane.xlu0 %504 }
 0x4ab   :  { %2067 = vpow2.f32 %v539_v20  ;;  %v527_v23 = vsub.f32 %v473_v48, %v505_v21 }
 0x4ad   :  { %v535_v24 = vmul.f32 1.442695, %v527_v23 }
 0x4ae   :  { %v514_v25 = vpop.xlane.xlu0 %513 }
 0x4af   :  { %2069 = vpow2.f32 %v535_v24  ;;  %v530_v26 = vsub.f32 %v484_v54, %v514_v25 }
 0x4b1   :  { %v541_v27 = vmul.f32 1.442695, %v530_v26  ;;  %v520_v28 = vpop.xlane.xlu1 %519 }
 0x4b2   :  { %v508_v29 = vpop.xlane.xlu0 %507  ;;  %v532_v40 = vsub.f32 %v492_v7, %v520_v28 }
 0x4b3   :  { %2071 = vpow2.f32 %v541_v27  ;;  %v528_v30 = vsub.f32 %v476_v3, %v508_v29 }
 0x4b4   :  { %v545_v50 = vmul.f32 1.442695, %v532_v40 }
 0x4b5   :  { %v2068_v31 = vpop.eup %2067  ;;  %v537_v32 = vmul.f32 1.442695, %v528_v30  ;;  %v598_v33 = vpop.permute.xlu1 %597 }
 0x4b6   :  { %1843 = vmatprep.subr.bf16.mxu1 %v598_v33  ;;  %v517_v53 = vpop.xlane.xlu0 %516  ;;  %v557_v58 = vsel %vm425_vm2, %v2068_v31, 0.0 }
 0x4b7   :  { %2073 = vpow2.f32 %v537_v32  ;;  %1844 = vmatpush3.bf16.msra.mxu1 %v598_v33  ;;  %558 = vadd.xlane.f32.xlu0 %v557_v58  ;;  %v531_v34 = vsub.f32 %v489_v9, %v517_v53 }
 0x4b9   :  { %v2070_v61 = vpop.eup %2069  ;;  %v543_v42 = vmul.f32 1.442695, %v531_v34 }
 0x4ba   :  { %v523_v35 = vpop.xlane.xlu0 %522  ;;  %v551_v36 = vsel %vm425_vm2, %v2070_v61, 0.0 }
 0x4bb   :  { %v533_v37 = vsub.f32 %v497_v12, %v523_v35  ;;  %552 = vadd.xlane.f32.xlu0 %v551_v36 }
 0x4bd   :  { %v2072_v39 = vpop.eup %2071  ;;  %v547_v44 = vmul.f32 1.442695, %v533_v37  ;;  %v2021_v37 = vld [vmem:[%s2666_s4] sm:$0xff]  }
 0x4be   :  { %v526_v45 = vpop.xlane.xlu0 %525  ;;  %v560_v47 = vsel %vm425_vm2, %v2072_v39, 0.0  ;;  %1854 = vmatpush3.bf16.msra.mxu0 %v2021_v37  ;;  %v2025_v37 = vld [vmem:[%s2664_s2 + $0x40] ss:$16 sps:$4 sm:$0xff]  }
 0x4bf   :  { %2075 = vpow2.f32 %v547_v44  ;;  %561 = vadd.xlane.f32.xlu0 %v560_v47  ;;  %v534_v51 = vsub.f32 %v500_v15, %v526_v45  ;;  %1855 = vmatprep.subr.bf16.mxu0 %v2174_v38 }
 0x4c0   :  { %2077 = vpow2.f32 %v543_v42 }
 0x4c1   :  { %v2074_v48 = vpop.eup %2073  ;;  %2079 = vpow2.f32 %v545_v50  ;;  %v549_v55 = vmul.f32 1.442695, %v534_v51  ;;  %v2024_v50 = vld [vmem:[%s2666_s4 + $0x18] sm:$0xff]  }
 0x4c2   :  { %v554_v54 = vsel %vm425_vm2, %v2074_v48, 0.0 }
 0x4c3   :  { %555 = vadd.xlane.f32.xlu0 %v554_v54  ;;  %2081 = vpow2.f32 %v549_v55 }
 0x4c9   :  { %v2076_v57 = vpop.eup %2075 }
 0x4ca   :  { %v569_v59 = vsel %vm425_vm2, %v2076_v57, 0.0  ;;  %v2078_v2 = vpop.eup %2077 }
 0x4cb   :  { %570 = vadd.xlane.f32.xlu0 %v569_v59  ;;  %v563_v3 = vsel %vm425_vm2, %v2078_v2, 0.0  ;;  %v2080_v4 = vpop.eup %2079 }
 0x4cc   :  { %v566_v5 = vsel %vm425_vm2, %v2080_v4, 0.0 }
 0x4cd   :  { %v2082_v7 = vpop.eup %2081 }
 0x4ce   :  { %v572_v8 = vsel %vm425_vm2, %v2082_v7, 0.0 }
 0x4cf   :  { %564 = vadd.xlane.f32.xlu0 %v563_v3 }
 0x4d3   :  { %567 = vadd.xlane.f32.xlu0 %v566_v5 }
 0x4d7   :  { %573 = vadd.xlane.f32.xlu0 %v572_v8 }
 0x544   :  { %v559_v9 = vpop.xlane.xlu0 %558 }
 0x548   :  { %v553_v10 = vpop.xlane.xlu0 %552 }
 0x54c   :  { %v562_v12 = vpop.xlane.xlu0 %561 }
 0x54d   :  { %2083 = vrcp.f32 %v562_v12 }
 0x54e   :  { %2085 = vrcp.f32 %v553_v10 }
 0x54f   :  { %2087 = vrcp.f32 %v559_v9 }
 0x550   :  { %v556_v13 = vpop.xlane.xlu0 %555 }
 0x551   :  { %2089 = vrcp.f32 %v556_v13 }
 0x557   :  { %v2084_v15 = vpop.eup %2083 }
 0x558   :  { %v571_v16 = vpop.xlane.xlu0 %570  ;;  %v2086_v17 = vpop.eup %2085  ;;  %v586_v20 = vmul.f32 %v2084_v15, %v2072_v39  ;;  %v2022_v39 = vld [vmem:[%s2666_s4 + $0x8] sm:$0xff]  }
 0x559   :  { %v2088_v18 = vpop.eup %2087  ;;  %v583_v23 = vmul.f32 %v2086_v17, %v2070_v61  ;;  %1856 = vmatpush3.bf16.msra.mxu0 %v2022_v39  ;;  %v2030_v39 = vld [vmem:[%s2664_s2 + $0x64] ss:$16 sps:$4 sm:$0xff]  }
 0x55a   :  { %v585_v25 = vmul.f32 %v2088_v18, %v2068_v31  ;;  %1857 = vmatprep.subr.bf16.mxu0 %v2174_v38 }
 0x55b   :  { %v2090_v19 = vpop.eup %2089 }
 0x55c   :  { %v565_v21 = vpop.xlane.xlu0 %564  ;;  %v584_v24 = vmul.f32 %v2090_v19, %v2074_v48  ;;  %v592_v27 = vpack.c.bf16 %v586_v20, %v585_v25  ;;  %v2023_v48 = vld [vmem:[%s2666_s4 + $0x10] sm:$0xff]  }
 0x55d   :  { %2091 = vrcp.f32 %v565_v21  ;;  %1858 = vmatpush3.bf16.msra.mxu0 %v2023_v48 }
 0x55e   :  { %v591_v26 = vpack.c.bf16 %v584_v24, %v583_v23  ;;  %1859 = vmatprep.subr.bf16.mxu0 %v2174_v38 }
 0x560   :  { %1845 = vmatprep.mubr.msk.bf16.mxu1 %vm425_vm2, %v591_v26  ;;  %v568_v28 = vpop.xlane.xlu0 %567 }
 0x561   :  { %2093 = vrcp.f32 %v568_v28  ;;  %1846 = vmatmul.mubr.msk.bf16.vlgmr.msra.gmra.mrb[12].mxu1 %vm425_vm2, %v592_v27  ;;  %1860 = vmatpush3.bf16.msra.mxu0 %v2024_v50 }
 0x562   :  { %2095 = vrcp.f32 %v571_v16  ;;  %1865 = vmatprep.subr.bf16.mxu0 %v2174_v38 }
 0x564   :  { %v574_v29 = vpop.xlane.xlu0 %573 }
 0x565   :  { %2097 = vrcp.f32 %v574_v29 }
 0x567   :  { %v2092_v30 = vpop.eup %2091 }
 0x568   :  { %v587_v33 = vmul.f32 %v2092_v30, %v2078_v2 }
 0x56b   :  { %v2094_v32 = vpop.eup %2093 }
 0x56c   :  { %v588_v53 = vmul.f32 %v2094_v32, %v2080_v4  ;;  %v2096_v58 = vpop.eup %2095 }
 0x56d   :  { %v589_v31 = vmul.f32 %v2096_v58, %v2076_v57 }
 0x56e   :  { %v593_v61 = vpack.c.bf16 %v588_v53, %v587_v33 }
 0x56f   :  { %v2098_v34 = vpop.eup %2097 }
 0x570   :  { %1849 = vmatprep.mubr.msk.bf16.mxu1 %vm425_vm2, %v593_v61  ;;  %v590_v35 = vmul.f32 %v2098_v34, %v2082_v7 }
 0x572   :  { %v594_v36 = vpack.c.bf16 %v590_v35, %v589_v31 }
 0x574   :  { %1850 = vmatmul.mubr.msk.bf16.gmra.mrb[16].mxu1 %vm425_vm2, %v594_v36  ;;  %v2027_v36 = vld [vmem:[%s2664_s2 + $0x44] ss:$16 sps:$4 sm:$0xff]  }
 0x575   :  { %909 = vmatprep.mubr.bf16.mxu1 %v2173_v22  ;;  %877 = vmatprep.subr.bf16.mxu1 %v2027_v36 }
 0x576   :  { %878 = vmatpush1.bf16.msra.mxu1 %v2025_v37 }
 0x577   :  { %879 = vmatprep.subr.bf16.mxu1 %v2030_v39 }
 0x634   :  { %v1847_v40 = vpop.f32.mrb[12].mxu1 }
 0x635   :  { %v646_v42 = vpop.f32.mrb[13].mxu1 }
 0x636   :  { %v1848_v44 = vpop.f32.mrb[14].mxu1 }
 0x637   :  { %v1956_v45 = vpack.i.bf16 %v1848_v44, %v1847_v40  ;;  %v649_v47 = vpop.f32.mrb[15].mxu1  ;;  %v2028_v40 = vld [vmem:[%s2664_s2 + $0x60] ss:$16 sps:$4 sm:$0xff]  }
 0x638   :  { %880 = vmatpush1.bf16.msra.mxu1 %v2028_v40 }
 0x639   :  { %1957 = vrot.lane.b32.xlu0 %v1956_v45, %s2180_s10 }
 0x647   :  { %v1851_v51 = vpop.f32.mrb[16].mxu1 }
 0x648   :  { %v662_v54 = vpop.f32.mrb[17].mxu1 }
 0x649   :  { %v1852_v55 = vpop.f32.mrb[18].mxu1 }
 0x64a   :  { %v1966_v57 = vpack.i.bf16 %v1852_v55, %v1851_v51  ;;  %v665_v59 = vpop.f32.mrb[19].mxu1 }
 0x64b   :  { %v1961_v2 = vpack.i.bf16 %v665_v59, %v662_v54  ;;  %v1692_v59 = vld [vmem:[%s2663_s1 + $0x1] ss:$0 sm:$0xff] }
 0x64d   :  { %1962 = vrot.lane.b32.xlu1 %v1961_v2, %s2181_s15 }
 0x651   :  { %1967 = vrot.lane.b32.xlu1 %v1966_v57, %s2182_s16 }
 0x6ab   :  { %v1958_v3 = vpop.permute.xlu0 %1957 }
 0x6ac   :  { %v1960_v5 = vunpack.i.h.bf16 %v1958_v3  ;;  %v1959_v7 = vunpack.i.l.bf16 %v1958_v3 }
 0x6ae   :  { %v702_v12 = vsel %vm425_vm2, %v649_v47, %v1960_v5  ;;  %v701_v13 = vsel %vm425_vm2, %v646_v42, %v1959_v7  ;;  %v2033_v42 = vld [vmem:[%s2664_s2 + $0x4c] ss:$16 sps:$4 sm:$0xff]   ;;  %v2031_v5 = vld [vmem:[%s2664_s2 + $0x48] ss:$16 sps:$4 sm:$0xff]  }
 0x6af   :  { %920 = vmatprep.subr.bf16.mxu1 %v2033_v42 }
 0x6bf   :  { %v1963_v4 = vpop.permute.xlu1 %1962 }
 0x6c0   :  { %v1965_v8 = vunpack.i.h.bf16 %v1963_v4  ;;  %v1964_v9 = vunpack.i.l.bf16 %v1963_v4 }
 0x6c2   :  { %v703_v17 = vsel %vm46_vm0, %v701_v13, %v1964_v9  ;;  %v704_v18 = vsel %vm46_vm0, %v702_v12, %v1965_v8  ;;  %v2036_v8 = vld [vmem:[%s2664_s2 + $0x6c] ss:$16 sps:$4 sm:$0xff]   ;;  %v2034_v9 = vld [vmem:[%s2664_s2 + $0x68] ss:$16 sps:$4 sm:$0xff]   ;;  %v2039_v13 = vld [vmem:[%s2665_s3 + $0x50] sm:$0xff]  }
 0x6c3   :  { %v1968_v10 = vpop.permute.xlu1 %1967  ;;  %v2038_v12 = vld [vmem:[%s2665_s3 + $0x48] sm:$0xff]  }
 0x6c4   :  { %v1970_v15 = vunpack.i.h.bf16 %v1968_v10  ;;  %v1969_v16 = vunpack.i.l.bf16 %v1968_v10  ;;  %v2037_v10 = vld [vmem:[%s2665_s3 + $0x40] sm:$0xff]  }
 0x6c6   :  { %v706_v19 = vsel %vm705_vm3, %v703_v17, %v1969_v16  ;;  %v707_v20 = vsel %vm705_vm3, %v704_v18, %v1970_v15  ;;  %v2040_v15 = vld [vmem:[%s2665_s3 + $0x58] sm:$0xff]   ;;  %v2041_v16 = vld [vmem:[%s2665_s3 + $0x60] sm:$0xff]   ;;  %v2042_v17 = vld [vmem:[%s2665_s3 + $0x68] sm:$0xff]  }
 0x6c7   :  { %v716_v21 = vpack.c.bf16 %v707_v20, %v706_v19  ;;  %v2043_v18 = vld [vmem:[%s2665_s3 + $0x70] sm:$0xff]   ;;  %v2044_v19 = vld [vmem:[%s2665_s3 + $0x78] sm:$0xff]  }
 0x6c9   :  { %1862 = vmatmul.mubr.msk.bf16.vlgmr.msra.gmra.mrb[4].mxu0 %vm741_vm4, %v716_v21 }
 0x6ca   :  { %1881 = vmatprep.mubr.msk.bf16.mxu0 %vm2175_vm1, %v2174_v38  ;;  %1866 = vmatpush3.bf16.msra.mxu0 %v2037_v10 }
 0x6cb   :  { %1867 = vmatprep.subr.bf16.mxu0 %v2174_v38 }
 0x6ce   :  { %1868 = vmatpush3.bf16.msra.mxu0 %v2038_v12 }
 0x6cf   :  { %1869 = vmatprep.subr.bf16.mxu0 %v2174_v38 }
 0x6d2   :  { %1870 = vmatpush3.bf16.msra.mxu0 %v2039_v13 }
 0x6d3   :  { %1871 = vmatprep.subr.bf16.mxu0 %v2174_v38 }
 0x6d6   :  { %1872 = vmatpush3.bf16.msra.mxu0 %v2040_v15 }
 0x6d7   :  { %1873 = vmatprep.subr.bf16.mxu0 %v2174_v38 }
 0x6da   :  { %1874 = vmatpush3.bf16.msra.mxu0 %v2041_v16 }
 0x6db   :  { %1875 = vmatprep.subr.bf16.mxu0 %v2174_v38 }
 0x6de   :  { %1876 = vmatpush3.bf16.msra.mxu0 %v2042_v17 }
 0x6df   :  { %1877 = vmatprep.subr.bf16.mxu0 %v2174_v38 }
 0x6e2   :  { %1878 = vmatpush3.bf16.msra.mxu0 %v2043_v18 }
 0x6e3   :  { %1879 = vmatprep.subr.bf16.mxu0 %v2174_v38 }
 0x6e6   :  { %1880 = vmatpush3.bf16.msra.mxu0 %v2044_v19 }
 0x6e7   :  { %1905 = vmatprep.subr.bf16.mxu0 %v2174_v38 }
 0x79c   :  { %v2460_v23 = vpop.f32.mrb[4].mxu0 }
 0x79d   :  { %v1917_v24 = vadd.f32 %v2460_v23, %v2233_v0  ;;  %v1863_v25 = vpop.f32.mrb[5].mxu0 }
 0x79e   :  { %v2464_v26 = vpop.f32.mrb[6].mxu0 }
 0x79f   :  { %v1918_v27 = vadd.f32 %v2464_v26, %v2238_v1  ;;  %v1864_v28 = vpop.f32.mrb[7].mxu0  ;;  %v790_v29 = vsel %vm46_vm0, %v1917_v24, 0.0 }
 0x7a0   :  { %791 = vadd.xlane.f32.xlu1 %v790_v29 }
 0x7a1   :  { %v793_v30 = vsel %vm46_vm0, %v1918_v27, 0.0 }
 0x7a2   :  { %794 = vadd.xlane.f32.xlu0 %v793_v30 }
 0x82d   :  { %v792_v32 = vpop.xlane.xlu1 %791 }
 0x82e   :  { %v796_v33 = vmul.f32 0.03125, %v792_v32 }
 0x82f   :  { %v795_v53 = vpop.xlane.xlu0 %794 }
 0x830   :  { %v798_v58 = vsub.f32 %v1917_v24, %v796_v33  ;;  %v797_v61 = vmul.f32 0.03125, %v795_v53 }
 0x832   :  { %v799_v34 = vsub.f32 %v1918_v27, %v797_v61  ;;  %v800_v0 = vmul.f32 %v798_v58, %v798_v58 }
 0x834   :  { %v802_v31 = vsel %vm46_vm0, %v800_v0, 0.0  ;;  %v801_v35 = vmul.f32 %v799_v34, %v799_v34 }
 0x835   :  { %803 = vadd.xlane.f32.xlu0 %v802_v31 }
 0x836   :  { %v805_v1 = vsel %vm46_vm0, %v801_v35, 0.0 }
 0x839   :  { %806 = vadd.xlane.f32.xlu0 %v805_v1 }
 0x8c2   :  { %v804_v44 = vpop.xlane.xlu0 %803 }
 0x8c3   :  { %v808_v45 = vmul.f32 0.03125, %v804_v44 }
 0x8c5   :  { %v810_v47 = vadd.f32 1e-05, %v808_v45 }
 0x8c6   :  { %v807_v48 = vpop.xlane.xlu0 %806 }
 0x8c7   :  { %2099 = vrsqrt.f32 %v810_v47  ;;  %v809_v50 = vmul.f32 0.03125, %v807_v48 }
 0x8c9   :  { %v811_v51 = vadd.f32 1e-05, %v809_v50 }
 0x8cb   :  { %2101 = vrsqrt.f32 %v811_v51 }
 0x8d1   :  { %v2100_v54 = vpop.eup %2099 }
 0x8d2   :  { %v814_v55 = vmul.f32 %v2100_v54, %v798_v58 }
 0x8d4   :  { %v822_v3 = vmul.f32 %v1692_v59, %v814_v55 }
 0x8d5   :  { %v2102_v57 = vpop.eup %2101 }
 0x8d6   :  { %v815_v2 = vmul.f32 %v2102_v57, %v799_v34 }
 0x8d8   :  { %v823_v4 = vmul.f32 %v1692_v59, %v815_v2 }
 0x8da   :  { %v833_v7 = vpack.c.bf16 %v823_v4, %v822_v3 }
 0x8dc   :  { %1709 = vmatmul.mubr.msk.bf16.vlgmr.msra.gmra.mrb[20].mxu1 %vm46_vm0, %v833_v7 }
 0x8dd   :  { %921 = vmatpush1.bf16.msra.mxu1 %v2031_v5  ;;  %952 = vmatprep.mubr.bf16.mxu1 %v2173_v22 }
 0x8de   :  { %922 = vmatprep.subr.bf16.mxu1 %v2036_v8 }
 0x8e1   :  { %923 = vmatpush1.bf16.msra.mxu1 %v2034_v9 }
 0x8e4   :  { %1710 = vmatmul.mubr.msk.bf16.vlgmr.msra.gmra.mrb[24].mxu1 %vm46_vm0, %v833_v7 }
 0x9af   :  { %v911_v20 = vpop.f32.mrb[20].mxu1 }
 0x9b0   :  { %v1088_v21 = vmul.f32 %v911_v20, %v2317_v46  ;;  %v913_v24 = vpop.f32.mrb[21].mxu1 }
 0x9b1   :  { %v915_v25 = vpop.f32.mrb[22].mxu1 }
 0x9b2   :  { %v1089_v27 = vmul.f32 %v915_v25, %v2322_v49  ;;  %1092 = vrot.lane.b32.xlu1 %v1088_v21, %s2176_s25  ;;  %v917_v28 = vpop.f32.mrb[23].mxu1 }
 0x9b4   :  { %1094 = vrot.lane.b32.xlu0 %v1089_v27, %s2176_s25 }
 0x9b7   :  { %v954_v29 = vpop.f32.mrb[24].mxu1 }
 0x9b8   :  { %v1711_v30 = vmul.f32 -1.442695, %v954_v29  ;;  %v2538_v32 = vpop.f32.mrb[25].mxu1 }
 0x9b9   :  { %v1100_v33 = vmul.f32 %v2538_v32, %v2334_v60  ;;  %v958_v53 = vpop.f32.mrb[26].mxu1 }
 0x9ba   :  { %2103 = vpow2.f32 %v1711_v30  ;;  %v1712_v58 = vmul.f32 -1.442695, %v958_v53  ;;  %v2542_v46 = vpop.f32.mrb[27].mxu1 }
 0x9bb   :  { %v1338_v49 = vpack.c.bf16 %v2542_v46, %v2538_v32  ;;  %1104 = vrot.lane.b32.xlu1 %v1100_v33, %s2177_s30  ;;  %v1101_v61 = vmul.f32 %v2542_v46, %v2344_v63 }
 0x9bc   :  { %2105 = vpow2.f32 %v1712_v58 }
 0x9bf   :  { %1106 = vrot.lane.b32.xlu1 %v1101_v61, %s2177_s30 }
 0x9c4   :  { %v2104_v34 = vpop.eup %2103 }
 0x9c5   :  { %v969_v0 = vadd.f32 1.0, %v2104_v34 }
 0x9c6   :  { %v2106_v31 = vpop.eup %2105 }
 0x9c7   :  { %2107 = vrcp.f32 %v969_v0  ;;  %v970_v60 = vadd.f32 1.0, %v2106_v31 }
 0x9c9   :  { %2109 = vrcp.f32 %v970_v60 }
 0x9d1   :  { %v2108_v35 = vpop.eup %2107 }
 0x9d2   :  { %v975_v1 = vmul.f32 %v2108_v35, %v954_v29 }
 0x9d3   :  { %v2110_v36 = vpop.eup %2109 }
 0x9d4   :  { %v977_v37 = vmul.f32 %v975_v1, %v913_v24  ;;  %v976_v39 = vmul.f32 %v2110_v36, %v958_v53 }
 0x9d6   :  { %v978_v40 = vmul.f32 %v976_v39, %v917_v28 }
 0x9d8   :  { %v996_v42 = vpack.c.bf16 %v978_v40, %v977_v37 }
 0x9da   :  { %1882 = vmatmul.mubr.bf16.vlgmr.msra.gmra.mrb[8].mxu0 %v996_v42 }
 0x9db   :  { %1913 = vmatprep.mubr.msk.bf16.mxu0 %vm2175_vm1, %v2174_v38 }
 0xa24   :  { %v1093_v63 = vpop.permute.xlu1 %1092 }
 0xa25   :  { %v1098_v45 = vadd.f32 %v1093_v63, %v1088_v21 }
 0xa26   :  { %v1095_v44 = vpop.permute.xlu0 %1094 }
 0xa27   :  { %v1099_v47 = vadd.f32 %v1095_v44, %v1089_v27 }
 0xa29   :  { %v1976_v48 = vpack.i.bf16 %v1099_v47, %v1098_v45  ;;  %v1164_v50 = vpack.c.bf16 %v1099_v47, %v1098_v45 }
 0xa2b   :  { %1977 = vrot.lane.b32.xlu0 %v1976_v48, %s2178_s6  ;;  %1887 = vmatprep.mubr.msk.bf16.mxu1 %vm425_vm2, %v1164_v50 }
 0xa2c   :  { %1972 = vrot.lane.b32.xlu1 %v1976_v48, %s2177_s30 }
 0xa2d   :  { %v1105_v51 = vpop.permute.xlu1 %1104 }
 0xa2e   :  { %v1110_v54 = vadd.f32 %v1105_v51, %v1100_v33 }
 0xa30   :  { %1982 = vrot.lane.b32.xlu1 %v1976_v48, %s2179_s9 }
 0xa31   :  { %v1107_v55 = vpop.permute.xlu1 %1106 }
 0xa32   :  { %v1111_v57 = vadd.f32 %v1107_v55, %v1101_v61 }
 0xa49   :  { %1132 = vxpose.xlu0.b32.start [1/2] (short) (narrow) %v1110_v54, 16 }
 0xa4d   :  { %1133 = vxpose.xlu0.b32.end [2/2] (short) (narrow) %v1111_v57, 16 }
 0xa9d   :  { %v1978_v59 = vpop.permute.xlu0 %1977 }
 0xa9e   :  { %v1973_v3 = vpop.permute.xlu1 %1972  ;;  %v1980_v9 = vunpack.i.h.bf16 %v1978_v59  ;;  %v1979_v10 = vunpack.i.l.bf16 %v1978_v59 }
 0xa9f   :  { %v1975_v5 = vunpack.i.h.bf16 %v1973_v3  ;;  %v1974_v7 = vunpack.i.l.bf16 %v1973_v3 }
 0xaa0   :  { %v1166_v13 = vpack.c.bf16 %v1980_v9, %v1979_v10 }
 0xaa1   :  { %v1165_v12 = vpack.c.bf16 %v1975_v5, %v1974_v7 }
 0xaa2   :  { %v1983_v15 = vpop.permute.xlu1 %1982 }
 0xaa3   :  { %v1985_v16 = vunpack.i.h.bf16 %v1983_v15  ;;  %v1984_v17 = vunpack.i.l.bf16 %v1983_v15 }
 0xaa5   :  { %v1167_v18 = vpack.c.bf16 %v1985_v16, %v1984_v17 }
 0xac9   :  { %v1148_v2 = vpop.trf.xlu0 }
 0xacd   :  { %v1149_v4 = vpop.trf.xlu0 }
 0xace   :  { %v1168_v8 = vpack.c.bf16 %v1149_v4, %v1148_v2 }
 0xad0   :  { %1885 = vmatprep.subr.bf16.mxu1 %v1168_v8 }
 0xad1   :  { %1886 = vmatpush3.bf16.msra.mxu1 %v1168_v8 }
 0xad4   :  { %1888 = vmatmul.mubr.msk.bf16.vlgmr.msra.gmra.mrb[28].mxu1 %vm425_vm2, %v1165_v12 }
 0xad5   :  { %1891 = vmatprep.mubr.msk.bf16.mxu1 %vm425_vm2, %v1166_v13 }
 0xadc   :  { %1892 = vmatmul.mubr.msk.bf16.gmra.mrb[32].mxu1 %vm425_vm2, %v1167_v18 }
 0xba7   :  { %v1889_v19 = vpop.f32.mrb[28].mxu1 }
 0xba8   :  { %v1215_v20 = vpop.f32.mrb[29].mxu1  ;;  %v1224_v27 = vadd.f32 %v1889_v19, %v2362_v41 }
 0xba9   :  { %v1216_v21 = vadd.f32 %v1215_v20, %v2367_v43  ;;  %v1890_v24 = vpop.f32.mrb[30].mxu1 }
 0xbaa   :  { %v1218_v25 = vpop.f32.mrb[31].mxu1  ;;  %v1227_v33 = vadd.f32 %v1890_v24, %v2375_v52  ;;  %v1252_v58 = vsel %vm425_vm2, %v1224_v27, -inf }
 0xbab   :  { %v1219_v28 = vadd.f32 %v1218_v25, %v2382_v56  ;;  %v1246_v29 = vsel %vm425_vm2, %v1216_v21, -inf }
 0xbac   :  { %1247 = vmax.xlane.f32.xlu1 %v1246_v29  ;;  %v1255_v41 = vsel %vm425_vm2, %v1227_v33, -inf }
 0xbad   :  { %v1249_v30 = vsel %vm425_vm2, %v1219_v28, -inf }
 0xbae   :  { %1250 = vmax.xlane.f32.xlu0 %v1249_v30 }
 0xbaf   :  { %v1893_v53 = vpop.f32.mrb[32].mxu1 }
 0xbb0   :  { %v1231_v61 = vpop.f32.mrb[33].mxu1  ;;  %1253 = vmax.xlane.f32.xlu1 %v1252_v58  ;;  %v1240_v0 = vadd.f32 %v1893_v53, %v2403_v11 }
 0xbb1   :  { %v1894_v43 = vpop.f32.mrb[34].mxu1  ;;  %v1232_v56 = vadd.f32 %v1231_v61, %v2394_v6 }
 0xbb2   :  { %v1234_v34 = vpop.f32.mrb[35].mxu1  ;;  %v1264_v31 = vsel %vm425_vm2, %v1240_v0, -inf  ;;  %v1243_v35 = vadd.f32 %v1894_v43, %v2410_v14 }
 0xbb3   :  { %v1235_v60 = vadd.f32 %v1234_v34, %v2387_v62  ;;  %v1258_v52 = vsel %vm425_vm2, %v1232_v56, -inf }
 0xbb4   :  { %1256 = vmax.xlane.f32.xlu1 %v1255_v41  ;;  %v1267_v11 = vsel %vm425_vm2, %v1243_v35, -inf }
 0xbb5   :  { %v1261_v1 = vsel %vm425_vm2, %v1235_v60, -inf }
 0xbb8   :  { %1265 = vmax.xlane.f32.xlu1 %v1264_v31 }
 0xbbc   :  { %1259 = vmax.xlane.f32.xlu1 %v1258_v52 }
 0xbc0   :  { %1262 = vmax.xlane.f32.xlu1 %v1261_v1 }
 0xbc4   :  { %1268 = vmax.xlane.f32.xlu1 %v1267_v11 }
 0xc39   :  { %v1248_v36 = vpop.xlane.xlu1 %1247 }
 0xc3a   :  { %v1270_v37 = vsub.f32 %v1216_v21, %v1248_v36 }
 0xc3b   :  { %v1251_v39 = vpop.xlane.xlu0 %1250 }
 0xc3c   :  { %v1278_v42 = vmul.f32 1.442695, %v1270_v37  ;;  %v1271_v63 = vsub.f32 %v1219_v28, %v1251_v39 }
 0xc3d   :  { %v1254_v6 = vpop.xlane.xlu1 %1253 }
 0xc3e   :  { %v1272_v40 = vsub.f32 %v1224_v27, %v1254_v6  ;;  %v1280_v45 = vmul.f32 1.442695, %v1271_v63 }
 0xc40   :  { %v1282_v44 = vmul.f32 1.442695, %v1272_v40 }
 0xc41   :  { %v1257_v62 = vpop.xlane.xlu1 %1256 }
 0xc42   :  { %2111 = vpow2.f32 %v1282_v44  ;;  %v1273_v47 = vsub.f32 %v1227_v33, %v1257_v62 }
 0xc43   :  { %2113 = vpow2.f32 %v1278_v42 }
 0xc44   :  { %2115 = vpow2.f32 %v1280_v45  ;;  %v1284_v50 = vmul.f32 1.442695, %v1273_v47  ;;  %v2045_v45 = vld [vmem:[%s2666_s4 + $0x20] sm:$0xff]   ;;  %v2046_v47 = vld [vmem:[%s2666_s4 + $0x28] sm:$0xff]  }
 0xc45   :  { %v1266_v14 = vpop.xlane.xlu1 %1265  ;;  %1906 = vmatpush3.bf16.msra.mxu0 %v2045_v45 }
 0xc46   :  { %v1276_v48 = vsub.f32 %v1240_v0, %v1266_v14  ;;  %1907 = vmatprep.subr.bf16.mxu0 %v2174_v38 }
 0xc48   :  { %v1290_v51 = vmul.f32 1.442695, %v1276_v48 }
 0xc49   :  { %v1260_v54 = vpop.xlane.xlu1 %1259  ;;  %1908 = vmatpush3.bf16.msra.mxu0 %v2046_v47 }
 0xc4a   :  { %2117 = vpow2.f32 %v1290_v51  ;;  %v1274_v55 = vsub.f32 %v1232_v56, %v1260_v54  ;;  %1909 = vmatprep.subr.bf16.mxu0 %v2174_v38 }
 0xc4b   :  { %2119 = vpow2.f32 %v1284_v50 }
 0xc4c   :  { %v2575_v57 = vpop.eup %2111  ;;  %v1286_v59 = vmul.f32 1.442695, %v1274_v55  ;;  %v2048_v55 = vld [vmem:[%s2666_s4 + $0x38] sm:$0xff]  }
 0xc4d   :  { %v1263_v2 = vpop.xlane.xlu1 %1262  ;;  %v1300_v3 = vsel %vm425_vm2, %v2575_v57, 0.0  ;;  %v2114_v4 = vpop.eup %2113 }
 0xc4e   :  { %2121 = vpow2.f32 %v1286_v59  ;;  %v1275_v5 = vsub.f32 %v1235_v60, %v1263_v2  ;;  %1301 = vadd.xlane.f32.xlu1 %v1300_v3  ;;  %v1294_v9 = vsel %vm425_vm2, %v2114_v4, 0.0  ;;  %v2116_v10 = vpop.eup %2115 }
 0xc4f   :  { %v1297_v16 = vsel %vm425_vm2, %v2116_v10, 0.0 }
 0xc50   :  { %v1288_v7 = vmul.f32 1.442695, %v1275_v5 }
 0xc51   :  { %v1269_v8 = vpop.xlane.xlu1 %1268 }
 0xc52   :  { %2123 = vpow2.f32 %v1288_v7  ;;  %v1277_v12 = vsub.f32 %v1243_v35, %v1269_v8  ;;  %1295 = vadd.xlane.f32.xlu1 %v1294_v9 }
 0xc54   :  { %v2118_v13 = vpop.eup %2117  ;;  %v1292_v15 = vmul.f32 1.442695, %v1277_v12 }
 0xc55   :  { %v1312_v17 = vsel %vm425_vm2, %v2118_v13, 0.0  ;;  %v2120_v18 = vpop.eup %2119 }
 0xc56   :  { %2125 = vpow2.f32 %v1292_v15  ;;  %1298 = vadd.xlane.f32.xlu1 %v1297_v16  ;;  %1313 = vadd.xlane.f32.xlu0 %v1312_v17  ;;  %v1303_v20 = vsel %vm425_vm2, %v2120_v18, 0.0 }
 0xc58   :  { %v2122_v19 = vpop.eup %2121 }
 0xc59   :  { %v1306_v21 = vsel %vm425_vm2, %v2122_v19, 0.0 }
 0xc5a   :  { %1304 = vadd.xlane.f32.xlu1 %v1303_v20  ;;  %1307 = vadd.xlane.f32.xlu0 %v1306_v21 }
 0xc5c   :  { %v2124_v24 = vpop.eup %2123 }
 0xc5d   :  { %v1309_v25 = vsel %vm425_vm2, %v2124_v24, 0.0 }
 0xc5e   :  { %1310 = vadd.xlane.f32.xlu1 %v1309_v25 }
 0xc60   :  { %v2126_v27 = vpop.eup %2125 }
 0xc61   :  { %v1315_v28 = vsel %vm425_vm2, %v2126_v27, 0.0 }
 0xc62   :  { %1316 = vadd.xlane.f32.xlu1 %v1315_v28 }
 0xc70   :  { %1340 = vrot.lane.b32.xlu0 %v1338_v49, %s2178_s6 }
 0xcdb   :  { %v1302_v29 = vpop.xlane.xlu1 %1301 }
 0xcdf   :  { %v1296_v30 = vpop.xlane.xlu1 %1295 }
 0xce0   :  { %2127 = vrcp.f32 %v1296_v30 }
 0xce3   :  { %v1314_v33 = vpop.xlane.xlu0 %1313  ;;  %v1299_v53 = vpop.xlane.xlu1 %1298 }
 0xce4   :  { %2129 = vrcp.f32 %v1299_v53 }
 0xce5   :  { %2131 = vrcp.f32 %v1302_v29  ;;  %v2148_v29 = vld [vmem:[%s2662_s0 + $0x8] sm:$0xff] }
 0xce6   :  { %v343_v30 = vadd.f32 nan, %v2148_v29 }
 0xce7   :  { %v1308_v58 = vpop.xlane.xlu0 %1307  ;;  %v1305_v61 = vpop.xlane.xlu1 %1304 }
 0xce8   :  { %2133 = vrcp.f32 %v1305_v61 }
 0xce9   :  { %2135 = vrcp.f32 %v1308_v58  ;;  %v787_v58 = vadd.f32 %v2464_v26, %v343_v30 }
 0xcea   :  { %v2128_v0 = vpop.eup %2127 }
 0xceb   :  { %v1341_v43 = vpop.permute.xlu0 %1340  ;;  %v1311_v34 = vpop.xlane.xlu1 %1310  ;;  %v1326_v49 = vmul.f32 %v2128_v0, %v2114_v4 }
 0xcec   :  { %2137 = vrcp.f32 %v1311_v34  ;;  %1895 = vmatprep.subr.bf16.mxu1 %v1341_v43 }
 0xced   :  { %1896 = vmatpush3.bf16.msra.mxu1 %v1341_v43  ;;  %2139 = vrcp.f32 %v1314_v33 }
 0xcee   :  { %v2130_v32 = vpop.eup %2129 }
 0xcef   :  { %v1317_v46 = vpop.xlane.xlu1 %1316  ;;  %v1327_v41 = vmul.f32 %v2130_v32, %v2116_v10  ;;  %v2132_v56 = vpop.eup %2131 }
 0xcf0   :  { %2141 = vrcp.f32 %v1317_v46  ;;  %v1328_v35 = vmul.f32 %v2132_v56, %v2575_v57 }
 0xcf1   :  { %v1334_v31 = vpack.c.bf16 %v1327_v41, %v1326_v49 }
 0xcf2   :  { %v2134_v60 = vpop.eup %2133 }
 0xcf3   :  { %v2136_v52 = vpop.eup %2135  ;;  %v1329_v1 = vmul.f32 %v2134_v60, %v2120_v18  ;;  %1897 = vmatprep.mubr.msk.bf16.mxu1 %vm425_vm2, %v1334_v31 }
 0xcf4   :  { %v1330_v37 = vmul.f32 %v2136_v52, %v2122_v19 }
 0xcf5   :  { %v1335_v36 = vpack.c.bf16 %v1329_v1, %v1328_v35 }
 0xcf6   :  { %v2138_v11 = vpop.eup %2137 }
 0xcf7   :  { %v1331_v39 = vmul.f32 %v2138_v11, %v2124_v24  ;;  %v2140_v6 = vpop.eup %2139  ;;  %1898 = vmatmul.mubr.msk.bf16.vlgmr.msra.gmra.mrb[36].mxu1 %vm425_vm2, %v1335_v36  ;;  %v2051_v36 = vld [vmem:[%s2667_s5 + $0x4] ss:$8 sps:$4 sm:$0xff]  }
 0xcf8   :  { %v1332_v63 = vmul.f32 %v2140_v6, %v2118_v13  ;;  %1594 = vmatprep.subr.bf16.mxu1 %v2051_v36  ;;  %v2052_v6 = vld [vmem:[%s2667_s5 + $0x10] ss:$8 sps:$4 sm:$0xff]  }
 0xcf9   :  { %v1336_v40 = vpack.c.bf16 %v1331_v39, %v1330_v37  ;;  %v2049_v37 = vld [vmem:[%s2667_s5] ss:$8 sps:$4 sm:$0xff]   ;;  %v2054_v39 = vld [vmem:[%s2667_s5 + $0x14] ss:$8 sps:$4 sm:$0xff]   ;;  %s2183_s5 = smov [#allocation2]  }
 0xcfa   :  { %v2142_v42 = vpop.eup %2141  ;;  %1595 = vmatpush1.bf16.msra.mxu1 %v2049_v37  ;;  %s1646_s28 = sshll.u32 %s2183_s5, 4  ;;  %s1647_s28 = int_to_ptr.vmem [resolvable:$true] %s1646_s28 }
 0xcfb   :  { %1901 = vmatprep.mubr.msk.bf16.mxu1 %vm425_vm2, %v1336_v40  ;;  %v1333_v44 = vmul.f32 %v2142_v42, %v2126_v27  ;;  %v2147_v27 = vld [vmem:[%s2662_s0] sm:$0xff]  ;;  %1596 = vmatprep.subr.bf16.mxu1 %v2054_v39  ;;  %s2149_s29 = scalar_lea.vmem %s1647_s28, 512  ;;  %p2154_p1 = scmp.lt.s32.totalorder %s1647_s28, %s1647_s28 }
 0xcfc   :  { %v342_v28 = vadd.f32 nan, %v2147_v27  ;;  %p2150_p0 = scmp.ne.s32.totalorder %s1647_s28, %s2149_s29  ;;  %p2155_p2 = scmp.lt.s32.totalorder %s2149_s29, %s2149_s29 }
 0xcfd   :  { %v1337_v62 = vpack.c.bf16 %v1333_v44, %v1332_v63 }
 0xcfe   :  { %v786_v33 = vadd.f32 %v2460_v23, %v342_v28  ;;  %1597 = vmatpush1.bf16.msra.mxu1 %v2052_v6  ;;  %p2156_p3 = por %p2155_p2, %p2154_p1 }
 0xcff   :  { %1902 = vmatmul.mubr.msk.bf16.gmra.mrb[40].mxu1 %vm425_vm2, %v1337_v62 }
 0xd00   :  { %1626 = vmatprep.mubr.bf16.mxu1 %v2173_v22  ;;  %v2047_v22 = vld [vmem:[%s2666_s4 + $0x30] sm:$0xff]   ;;  %p2157_p4 = pnand %p2156_p3, %p2150_p0 }
 0xd01   :  { %1910 = vmatpush3.bf16.msra.mxu0 %v2047_v22  ;;  %v1759_v22 = vld [vmem:[%s2663_s1 + $0x2] ss:$0 sm:$0xff] }
 0xd02   :  { %1911 = vmatprep.subr.bf16.mxu0 %v2174_v38 }
 0xd05   :  { %1912 = vmatpush3.bf16.msra.mxu0 %v2048_v55 }
 0xdca   :  { %v1899_v14 = vpop.f32.mrb[36].mxu1 }
 0xdcb   :  { %v1389_v48 = vpop.f32.mrb[37].mxu1 }
 0xdcc   :  { %v1900_v50 = vpop.f32.mrb[38].mxu1 }
 0xdcd   :  { %v1986_v51 = vpack.i.bf16 %v1900_v50, %v1899_v14  ;;  %v1392_v54 = vpop.f32.mrb[39].mxu1 }
 0xdcf   :  { %1987 = vrot.lane.b32.xlu1 %v1986_v51, %s2180_s10 }
 0xdd2   :  { %v1903_v57 = vpop.f32.mrb[40].mxu1 }
 0xdd3   :  { %v1405_v59 = vpop.f32.mrb[41].mxu1 }
 0xdd4   :  { %v1904_v2 = vpop.f32.mrb[42].mxu1 }
 0xdd5   :  { %v1996_v3 = vpack.i.bf16 %v1904_v2, %v1903_v57  ;;  %v1408_v4 = vpop.f32.mrb[43].mxu1 }
 0xdd6   :  { %v1991_v5 = vpack.i.bf16 %v1408_v4, %v1405_v59 }
 0xdd8   :  { %1992 = vrot.lane.b32.xlu1 %v1991_v5, %s2181_s15 }
 0xddc   :  { %1997 = vrot.lane.b32.xlu1 %v1996_v3, %s2182_s16 }
 0xe41   :  { %v1988_v7 = vpop.permute.xlu1 %1987 }
 0xe42   :  { %v1990_v38 = vunpack.i.h.bf16 %v1988_v7  ;;  %v1989_v9 = vunpack.i.l.bf16 %v1988_v7 }
 0xe44   :  { %v1445_v15 = vsel %vm425_vm2, %v1392_v54, %v1990_v38  ;;  %v1444_v16 = vsel %vm425_vm2, %v1389_v48, %v1989_v9 }
 0xe4a   :  { %v1993_v8 = vpop.permute.xlu1 %1992 }
 0xe4b   :  { %v1995_v10 = vunpack.i.h.bf16 %v1993_v8  ;;  %v1994_v12 = vunpack.i.l.bf16 %v1993_v8 }
 0xe4d   :  { %v1446_v19 = vsel %vm46_vm0, %v1444_v16, %v1994_v12  ;;  %v1447_v20 = vsel %vm46_vm0, %v1445_v15, %v1995_v10 }
 0xe4e   :  { %v1998_v13 = vpop.permute.xlu1 %1997 }
 0xe4f   :  { %v2000_v17 = vunpack.i.h.bf16 %v1998_v13  ;;  %v1999_v18 = vunpack.i.l.bf16 %v1998_v13 }
 0xe51   :  { %v1448_v21 = vsel %vm705_vm3, %v1446_v19, %v1999_v18  ;;  %v1449_v24 = vsel %vm705_vm3, %v1447_v20, %v2000_v17 }
 0xe52   :  { %v1459_v25 = vpack.c.bf16 %v1449_v24, %v1448_v21 }
 0xe54   :  { %1914 = vmatmul.mubr.msk.bf16.vlgmr.msra.gmra.mrb[8].mxu0 %vm741_vm4, %v1459_v25 }
 0xf27   :  { %v1521_v53 = vpop.f32.mrb[8].mxu0 }
 0xf28   :  { %v1919_v61 = vadd.f32 %v1521_v53, %v786_v33  ;;  %v1915_v43 = vpop.f32.mrb[9].mxu0 }
 0xf29   :  { %v1524_v34 = vpop.f32.mrb[10].mxu0 }
 0xf2a   :  { %v1920_v0 = vadd.f32 %v1524_v34, %v787_v58  ;;  %v1916_v32 = vpop.f32.mrb[11].mxu0  ;;  %v1532_v46 = vsel %vm46_vm0, %v1919_v61, 0.0 }
 0xf2b   :  { %1533 = vadd.xlane.f32.xlu0 %v1532_v46 }
 0xf2c   :  { %v1535_v49 = vsel %vm46_vm0, %v1920_v0, 0.0 }
 0xf2d   :  { %1536 = vadd.xlane.f32.xlu1 %v1535_v49 }
 0xfb8   :  { %v1534_v41 = vpop.xlane.xlu0 %1533 }
 0xfb9   :  { %v1538_v56 = vmul.f32 0.03125, %v1534_v41 }
 0xfba   :  { %v1537_v31 = vpop.xlane.xlu1 %1536 }
 0xfbb   :  { %v1540_v60 = vsub.f32 %v1919_v61, %v1538_v56  ;;  %v1539_v52 = vmul.f32 0.03125, %v1537_v31 }
 0xfbd   :  { %v1541_v23 = vsub.f32 %v1920_v0, %v1539_v52  ;;  %v1542_v35 = vmul.f32 %v1540_v60, %v1540_v60 }
 0xfbf   :  { %v1544_v26 = vsel %vm46_vm0, %v1542_v35, 0.0  ;;  %v1543_v1 = vmul.f32 %v1541_v23, %v1541_v23 }
 0xfc0   :  { %1545 = vadd.xlane.f32.xlu0 %v1544_v26 }
 0xfc1   :  { %v1547_v11 = vsel %vm46_vm0, %v1543_v1, 0.0 }
 0xfc4   :  { %1548 = vadd.xlane.f32.xlu0 %v1547_v11 }
0x104d   :  { %v1546_v40 = vpop.xlane.xlu0 %1545 }
0x104e   :  { %v1550_v42 = vmul.f32 0.03125, %v1546_v40 }
0x1050   :  { %v1552_v63 = vadd.f32 1e-05, %v1550_v42 }
0x1051   :  { %v1549_v44 = vpop.xlane.xlu0 %1548 }
0x1052   :  { %2143 = vrsqrt.f32 %v1552_v63  ;;  %v1551_v62 = vmul.f32 0.03125, %v1549_v44 }
0x1054   :  { %v1553_v45 = vadd.f32 1e-05, %v1551_v62 }
0x1056   :  { %2145 = vrsqrt.f32 %v1553_v45 }
0x105c   :  { %v2144_v47 = vpop.eup %2143 }
0x105d   :  { %v1556_v14 = vmul.f32 %v2144_v47, %v1540_v60 }
0x105f   :  { %v1564_v51 = vmul.f32 %v1759_v22, %v1556_v14 }
0x1060   :  { %v2146_v48 = vpop.eup %2145 }
0x1061   :  { %v1557_v50 = vmul.f32 %v2146_v48, %v1541_v23 }
0x1063   :  { %v1565_v54 = vmul.f32 %v1759_v22, %v1557_v50 }
0x1065   :  { %v1570_v55 = vpack.c.bf16 %v1565_v54, %v1564_v51 }
0x1067   :  { %1764 = vmatmul.mubr.msk.bf16.vlgmr.msra.gmra.mrb[44].mxu1 %vm46_vm0, %v1570_v55 }
0x113a   :  { %v1628_v57 = vpop.f32.mrb[44].mxu1 }
0x113b   :  { %1637 = vst [vmem:[#allocation2] sm:$0xff] %v1628_v57  ;;  %v1630_v59 = vpop.f32.mrb[45].mxu1 }
0x113c   :  { %1638 = vst [vmem:[#allocation2 + $0x8] sm:$0xff] %v1630_v59  ;;  %v1632_v2 = vpop.f32.mrb[46].mxu1 }
0x113d   :  { %1639 = vst [vmem:[#allocation2 + $0x10] sm:$0xff] %v1632_v2  ;;  %v1634_v3 = vpop.f32.mrb[47].mxu1 }
0x113e   :  { %1640 = vst [vmem:[#allocation2 + $0x18] sm:$0xff] %v1634_v3 }
0x113f   :  { %2160 = shalt.err (!%p2157_p4)
}
0x1140   :  { %s2161_s12 = scalar_lea.hbm %s2670_s8, 512 }
0x1141   :  { %p2162_p5 = scmp.ne.s32.totalorder %s2670_s8, %s2161_s12  ;;  %p2165_p6 = scmp.lt.u32.totalorder %s2161_s12, %s2670_s8 }
0x1143   :  { %p2167_p7 = pnand %p2165_p6, %p2162_p5 }
0x1145   :  { %2170 = shalt.err (!%p2167_p7)
}
0x1146   :  { %s2184_s6 = smov 256  }
0x1147   :  { %1652 = dma.vmem_to_hbm [thread:$0]  %s1647_s28, 512, %s2670_s8, [#allocation3], %s2184_s6, %s2184_s6, %s2180_s10  }
0x1148   :  { %2171 = dma.done.wait [#allocation3], 512  }
0x1149   :  { %2172 = vsyncadd [#allocation3], 4294966784 }
0x114a   :  { %1656 = vsyncpa [#allocation3], 1 }

</bundles_post_ra>
